<compile_context>
chip_gen: v7x
topology: tpu7x:2x2x1
jax: 0.10.0
libtpu: 0.0.40
codegen_flags: <defaults>
</compile_context>

<pallas_src>
import functools

import jax
import jax.numpy as jnp
from jax.experimental import pallas as pl
from jax.experimental.pallas import tpu as pltpu

n_embd = 384
blocksize = 64  # causal mask size upper bound (T <= blocksize)

_MASK_NEG = -1e30  # finite "-inf" to avoid inf-inf NaN hazards


# ----------------------------- kernel ---------------------------------------


def _mha_fused_kernel(x_ref, wqkv_ref, wproj_ref, bproj_ref, o_ref,
                      *, num_heads, head_size):
    """One block of Bt batch elements per grid step: full MHA forward."""
    Bt, T, C = x_ref.shape
    H, hs = num_heads, head_size
    HS = H * hs
    M = Bt * T
    scale = hs ** -0.5

    # Fold batch into the M dimension for the big projections (97% of FLOPs).
    x = x_ref[...].reshape(M, C).astype(jnp.bfloat16)     # bf16 MXU path

    # QKV projection split into three (M, C) @ (C, HS) matmuls via static
    # ref slices (zero-cost; keeps live intermediates at HS lanes each).
    q = jnp.dot(x, wqkv_ref[:, 0:HS], preferred_element_type=jnp.float32)
    k = jnp.dot(x, wqkv_ref[:, HS:2 * HS], preferred_element_type=jnp.float32)
    v = jnp.dot(x, wqkv_ref[:, 2 * HS:3 * HS],
                preferred_element_type=jnp.float32)
    q = q * scale                       # fold softmax scale once (not per head)

    qb = q.reshape(Bt, T, HS)
    kb = k.reshape(Bt, T, HS)
    vb = v.reshape(Bt, T, HS)

    # Causal mask as an additive f32 bias, built + broadcast once for all heads.
    row = jax.lax.broadcasted_iota(jnp.int32, (T, T), 0)
    col = jax.lax.broadcasted_iota(jnp.int32, (T, T), 1)
    bias = jnp.where(col <= row, 0.0, _MASK_NEG).astype(jnp.float32)
    bias = jax.lax.broadcast_in_dim(bias, (Bt, T, T), (1, 2))  # hoisted

    head_outs = []
    for h in range(H):                  # static unroll; ops are batched over Bt
        sl = slice(h * hs, (h + 1) * hs)
        qh, kh, vh = qb[:, :, sl], kb[:, :, sl], vb[:, :, sl]

        s = jnp.einsum('bqd,bkd->bqk', qh, kh,
                       preferred_element_type=jnp.float32) + bias
        s = s - jnp.max(s, axis=-1, keepdims=True)
        p = jnp.exp(s)
        p = p * pl.reciprocal(jnp.sum(p, axis=-1, keepdims=True), approx=True)
        # TODO(synk): attention dropout omitted (eval-mode identity)

        head_outs.append(jnp.einsum('bqk,bkd->bqd', p, vh,
                                    preferred_element_type=jnp.float32))

    concat = jnp.concatenate(head_outs, axis=-1).reshape(M, HS)  # lane-dense

    # Output projection (+ bias); weights stored bf16, upcast once in VMEM.
    proj = jnp.dot(concat, wproj_ref[...].astype(jnp.float32),
                   preferred_element_type=jnp.float32)
    out = proj + bproj_ref[...]
    o_ref[...] = out.reshape(Bt, T, C).astype(o_ref.dtype)


# ----------------------------- wrapper ---------------------------------------


def pack_mha_params(wq, wk, wv, w_proj, b_proj, dtype=jnp.bfloat16):
    """Pack weights ONCE (call at model init, not per forward).

    wq/wk/wv: (H, hs, C); w_proj: (C, H*hs); b_proj: (C,).
    Columns of w_qkv: [q_h0..q_h(H-1) | k_h0..k_h(H-1) | v_h0..v_h(H-1)].
    """
    H, hs, C = wq.shape
    w_qkv = jnp.concatenate(
        [wq.reshape(H * hs, C).T,
         wk.reshape(H * hs, C).T,
         wv.reshape(H * hs, C).T], axis=1).astype(dtype)      # (C, 3*H*hs)
    w_proj_t = w_proj.T.astype(dtype)                          # (H*hs, C)
    b_proj_r = b_proj.reshape(1, C).astype(jnp.float32)        # (1, C)
    return w_qkv, w_proj_t, b_proj_r


def multi_head_attention(x, packed_params, num_heads, head_size,
                         batch_tile=None):
    """x: (B, T, C); packed_params from pack_mha_params()."""
    B, T, C = x.shape
    H, hs = num_heads, head_size
    w_qkv, w_proj_t, b_proj_r = packed_params

    # Batch-tile sizing: target ~256 MXU rows per step (v6e/v7x 256^2 MXU;
    # 128 already saturates v5e), but keep >= 2 grid steps when the batch
    # allows so v7x's two TensorCores are both used.
    if batch_tile is None:
        bt = max(1, min(B, 256 // max(T, 1)))
        if B >= 2:
            bt = max(1, min(bt, B // 2))
        while B % bt:
            bt -= 1
    else:
        bt = batch_tile
    grid = (B // bt,)

    kernel = functools.partial(_mha_fused_kernel,
                               num_heads=H, head_size=hs)
    out = pl.pallas_call(
        kernel,
        out_shape=jax.ShapeDtypeStruct((B, T, C), x.dtype),
        grid=grid,
        in_specs=[
            pl.BlockSpec((bt, T, C), lambda b: (b, 0, 0)),
            # Weight blocks never change across the grid.
            # (pipeline_mode=pl.Buffered(1) would save VMEM headroom; left at
            #  default double-buffering since VMEM is nowhere near the limit.)
            pl.BlockSpec(w_qkv.shape, lambda b: (0, 0)),
            pl.BlockSpec(w_proj_t.shape, lambda b: (0, 0)),
            pl.BlockSpec(b_proj_r.shape, lambda b: (0, 0)),
        ],
        out_specs=pl.BlockSpec((bt, T, C), lambda b: (b, 0, 0)),
        compiler_params=pltpu.CompilerParams(
            dimension_semantics=("parallel",)),
    )(x, w_qkv, w_proj_t, b_proj_r)

    # TODO(synk): output dropout omitted (eval-mode identity)
    return out


# ----------------------------- reference ------------------------------------


def reference(x, wq, wk, wv, w_proj, b_proj):
    B, T, C = x.shape
    H, hs, _ = wq.shape
    outs = []
    for h in range(H):
        q = x @ wq[h].T
        k = x @ wk[h].T
        v = x @ wv[h].T
        wei = (q @ jnp.swapaxes(k, -2, -1)) * (hs ** -0.5)
        mask = jnp.tril(jnp.ones((T, T), dtype=bool))
        wei = jnp.where(mask, wei, -jnp.inf)
        wei = jax.nn.softmax(wei, axis=-1)
        outs.append(wei @ v)
    cat = jnp.concatenate(outs, axis=-1)
    return cat @ w_proj.T + b_proj


# ----------------------------- main ------------------------------------------


def _round_bf16(a):
    # Round to bf16-representable values so kernel (bf16 storage/MXU) and
    # f32 reference see identical weights/activations.
    return a.astype(jnp.bfloat16).astype(jnp.float32)


if __name__ == "__main__":
    num_head = 6
    head_size = 64          # num_head * head_size == n_embd == 384
    B, T = 2, 8             # T <= blocksize

    key = jax.random.PRNGKey(0)
    kx, kq, kk, kv, kpw, kpb = jax.random.split(key, 6)

    x = jax.random.normal(kx, (B, T, n_embd), dtype=jnp.float32)

    # PyTorch nn.Linear default init: U(-1/sqrt(fan_in), 1/sqrt(fan_in))
    lim_qkv = 1.0 / (n_embd ** 0.5)
    wq = jax.random.uniform(kq, (num_head, head_size, n_embd),
                            minval=-lim_qkv, maxval=lim_qkv, dtype=jnp.float32)
    wk = jax.random.uniform(kk, (num_head, head_size, n_embd),
                            minval=-lim_qkv, maxval=lim_qkv, dtype=jnp.float32)
    wv = jax.random.uniform(kv, (num_head, head_size, n_embd),
                            minval=-lim_qkv, maxval=lim_qkv, dtype=jnp.float32)

    fan_in_proj = num_head * head_size
    lim_p = 1.0 / (fan_in_proj ** 0.5)
    w_proj = jax.random.uniform(kpw, (n_embd, fan_in_proj),
                                minval=-lim_p, maxval=lim_p, dtype=jnp.float32)
    b_proj = jax.random.uniform(kpb, (n_embd,),
                                minval=-lim_p, maxval=lim_p, dtype=jnp.float32)

    # Make inputs/weights bf16-representable so the bf16 kernel path and the
    # f32 reference agree up to accumulation order.
    x, wq, wk, wv, w_proj = map(_round_bf16, (x, wq, wk, wv, w_proj))

    # Pack once (model-init time), reuse across calls.
    packed = pack_mha_params(wq, wk, wv, w_proj, b_proj)
    packed = jax.block_until_ready(packed)

    out = multi_head_attention(x, packed, num_head, head_size)
    out = jax.block_until_ready(out)

    ref = jax.block_until_ready(reference(x, wq, wk, wv, w_proj, b_proj))
    assert out.shape == (B, T, n_embd)
    assert jnp.allclose(out, ref, rtol=5e-3, atol=5e-3), (
        float(jnp.max(jnp.abs(out - ref))))

    print("KERNEL_OK")
</pallas_src>

<mosaic_0001>
module attributes {stable_mosaic.version = 11 : i64} {
  func.func @_mha_fused_kernel(%arg0: i32, %arg1: memref<1x8x384xf32, #tpu.memory_space<vmem>>, %arg2: memref<384x1152xbf16, #tpu.memory_space<vmem>>, %arg3: memref<384x384xbf16, #tpu.memory_space<vmem>>, %arg4: memref<1x384xf32, #tpu.memory_space<vmem>>, %arg5: memref<1x8x384xf32, #tpu.memory_space<vmem>>) attributes {dimension_semantics = [#tpu.dimension_semantics<parallel>], iteration_bounds = array<i64: 2>, scalar_prefetch = 0 : i64, scratch_operands = 0 : i64, tpu.core_type = #tpu.core_type<tc>, window_params = [{transform_indices = @transform_0, window_bounds = array<i64: 1, 8, 384>}, {pipeline_mode = #tpu.pipeline_mode<synchronous>, transform_indices = @transform_1, window_bounds = array<i64: 384, 1152>}, {pipeline_mode = #tpu.pipeline_mode<synchronous>, transform_indices = @transform_2, window_bounds = array<i64: 384, 384>}, {pipeline_mode = #tpu.pipeline_mode<synchronous>, transform_indices = @transform_3, window_bounds = array<i64: 1, 384>}, {transform_indices = @transform_4, window_bounds = array<i64: 1, 8, 384>}]} {
    %c0 = arith.constant 0 : index
    %c0_0 = arith.constant 0 : index
    %c0_1 = arith.constant 0 : index
    %0 = vector.load %arg1[%c0, %c0_0, %c0_1] : memref<1x8x384xf32, #tpu.memory_space<vmem>>, vector<1x8x384xf32>
    %1 = vector.shape_cast %0 : vector<1x8x384xf32> to vector<8x384xf32>
    %2 = arith.truncf %1 : vector<8x384xf32> to vector<8x384xbf16>
    %c0_2 = arith.constant 0 : index
    %c0_3 = arith.constant 0 : index
    %3 = vector.load %arg2[%c0_2, %c0_3] : memref<384x1152xbf16, #tpu.memory_space<vmem>>, vector<384x384xbf16>
    %cst = arith.constant dense<0.000000e+00> : vector<8x384xf32>
    %4 = tpu.matmul %2, %3, %cst {dimension_numbers = #tpu.dot_dimension_numbers<[1], [0], [0], [1], [0, 0, 1, 1], [], []>} : vector<8x384xbf16>, vector<384x384xbf16>, vector<8x384xf32> -> vector<8x384xf32>
    %c0_4 = arith.constant 0 : index
    %c384 = arith.constant 384 : index
    %5 = vector.load %arg2[%c0_4, %c384] : memref<384x1152xbf16, #tpu.memory_space<vmem>>, vector<384x384xbf16>
    %cst_5 = arith.constant dense<0.000000e+00> : vector<8x384xf32>
    %6 = tpu.matmul %2, %5, %cst_5 {dimension_numbers = #tpu.dot_dimension_numbers<[1], [0], [0], [1], [0, 0, 1, 1], [], []>} : vector<8x384xbf16>, vector<384x384xbf16>, vector<8x384xf32> -> vector<8x384xf32>
    %c0_6 = arith.constant 0 : index
    %c768 = arith.constant 768 : index
    %7 = vector.load %arg2[%c0_6, %c768] : memref<384x1152xbf16, #tpu.memory_space<vmem>>, vector<384x384xbf16>
    %cst_7 = arith.constant dense<0.000000e+00> : vector<8x384xf32>
    %8 = tpu.matmul %2, %7, %cst_7 {dimension_numbers = #tpu.dot_dimension_numbers<[1], [0], [0], [1], [0, 0, 1, 1], [], []>} : vector<8x384xbf16>, vector<384x384xbf16>, vector<8x384xf32> -> vector<8x384xf32>
    %cst_8 = arith.constant 1.250000e-01 : f32
    %9 = vector.broadcast %cst_8 : f32 to vector<8x384xf32>
    %10 = arith.mulf %4, %9 : vector<8x384xf32>
    %11 = vector.shape_cast %10 : vector<8x384xf32> to vector<1x8x384xf32>
    %12 = vector.shape_cast %6 : vector<8x384xf32> to vector<1x8x384xf32>
    %13 = vector.shape_cast %8 : vector<8x384xf32> to vector<1x8x384xf32>
    %14 = tpu.iota {dimensions = array<i32: 0>} : vector<8x8xi32>
    %15 = tpu.iota {dimensions = array<i32: 1>} : vector<8x8xi32>
    %16 = arith.cmpi sle, %15, %14 : vector<8x8xi32>
    %cst_9 = arith.constant 0.000000e+00 : f32
    %cst_10 = arith.constant -1.000000e+30 : f32
    %17 = vector.broadcast %cst_9 : f32 to vector<8x8xf32>
    %18 = vector.broadcast %cst_10 : f32 to vector<8x8xf32>
    %19 = arith.select %16, %17, %18 : vector<8x8xi1>, vector<8x8xf32>
    %20 = vector.shape_cast %19 : vector<8x8xf32> to vector<1x8x8xf32>
    %21 = vector.extract_strided_slice %11 {offsets = [0, 0, 0], sizes = [1, 8, 64], strides = [1, 1, 1]} : vector<1x8x384xf32> to vector<1x8x64xf32>
    %22 = vector.extract_strided_slice %12 {offsets = [0, 0, 0], sizes = [1, 8, 64], strides = [1, 1, 1]} : vector<1x8x384xf32> to vector<1x8x64xf32>
    %23 = vector.extract_strided_slice %13 {offsets = [0, 0, 0], sizes = [1, 8, 64], strides = [1, 1, 1]} : vector<1x8x384xf32> to vector<1x8x64xf32>
    "tpu.trace_start"() <{level = 10 : i32, message = "bqd,bkd->bqk"}> : () -> ()
    %cst_11 = arith.constant dense<0.000000e+00> : vector<1x8x8xf32>
    %24 = tpu.matmul %21, %22, %cst_11 {dimension_numbers = #tpu.dot_dimension_numbers<[2], [2], [1], [1], [0, 0, 0, 1, 1, 1], [0], [0]>} : vector<1x8x64xf32>, vector<1x8x64xf32>, vector<1x8x8xf32> -> vector<1x8x8xf32>
    "tpu.trace_stop"() : () -> ()
    %25 = arith.addf %24, %20 : vector<1x8x8xf32>
    %cst_12 = arith.constant dense<0xFF800000> : vector<1x8xf32>
    %26 = vector.multi_reduction <maximumf>, %25, %cst_12 [2] : vector<1x8x8xf32> to vector<1x8xf32>
    %27 = vector.shape_cast %26 : vector<1x8xf32> to vector<1x8x1xf32>
    %28 = vector.broadcast %27 : vector<1x8x1xf32> to vector<1x8x8xf32>
    %29 = arith.subf %25, %28 : vector<1x8x8xf32>
    %30 = math.exp %29 : vector<1x8x8xf32>
    %cst_13 = arith.constant dense<0.000000e+00> : vector<1x8xf32>
    %31 = vector.multi_reduction <add>, %30, %cst_13 [2] : vector<1x8x8xf32> to vector<1x8xf32>
    %32 = vector.shape_cast %31 : vector<1x8xf32> to vector<1x8x1xf32>
    %33 = tpu.reciprocal %32 {approx = true} : vector<1x8x1xf32> -> vector<1x8x1xf32>
    %34 = vector.broadcast %33 : vector<1x8x1xf32> to vector<1x8x8xf32>
    %35 = arith.mulf %30, %34 : vector<1x8x8xf32>
    "tpu.trace_start"() <{level = 10 : i32, message = "bqk,bkd->bqd"}> : () -> ()
    %cst_14 = arith.constant dense<0.000000e+00> : vector<1x8x64xf32>
    %36 = tpu.matmul %35, %23, %cst_14 {dimension_numbers = #tpu.dot_dimension_numbers<[2], [1], [1], [2], [0, 0, 0, 1, 1, 2], [0], [0]>} : vector<1x8x8xf32>, vector<1x8x64xf32>, vector<1x8x64xf32> -> vector<1x8x64xf32>
    "tpu.trace_stop"() : () -> ()
    %37 = vector.extract_strided_slice %11 {offsets = [0, 0, 64], sizes = [1, 8, 64], strides = [1, 1, 1]} : vector<1x8x384xf32> to vector<1x8x64xf32>
    %38 = vector.extract_strided_slice %12 {offsets = [0, 0, 64], sizes = [1, 8, 64], strides = [1, 1, 1]} : vector<1x8x384xf32> to vector<1x8x64xf32>
    %39 = vector.extract_strided_slice %13 {offsets = [0, 0, 64], sizes = [1, 8, 64], strides = [1, 1, 1]} : vector<1x8x384xf32> to vector<1x8x64xf32>
    "tpu.trace_start"() <{level = 10 : i32, message = "bqd,bkd->bqk"}> : () -> ()
    %cst_15 = arith.constant dense<0.000000e+00> : vector<1x8x8xf32>
    %40 = tpu.matmul %37, %38, %cst_15 {dimension_numbers = #tpu.dot_dimension_numbers<[2], [2], [1], [1], [0, 0, 0, 1, 1, 1], [0], [0]>} : vector<1x8x64xf32>, vector<1x8x64xf32>, vector<1x8x8xf32> -> vector<1x8x8xf32>
    "tpu.trace_stop"() : () -> ()
    %41 = arith.addf %40, %20 : vector<1x8x8xf32>
    %cst_16 = arith.constant dense<0xFF800000> : vector<1x8xf32>
    %42 = vector.multi_reduction <maximumf>, %41, %cst_16 [2] : vector<1x8x8xf32> to vector<1x8xf32>
    %43 = vector.shape_cast %42 : vector<1x8xf32> to vector<1x8x1xf32>
    %44 = vector.broadcast %43 : vector<1x8x1xf32> to vector<1x8x8xf32>
    %45 = arith.subf %41, %44 : vector<1x8x8xf32>
    %46 = math.exp %45 : vector<1x8x8xf32>
    %cst_17 = arith.constant dense<0.000000e+00> : vector<1x8xf32>
    %47 = vector.multi_reduction <add>, %46, %cst_17 [2] : vector<1x8x8xf32> to vector<1x8xf32>
    %48 = vector.shape_cast %47 : vector<1x8xf32> to vector<1x8x1xf32>
    %49 = tpu.reciprocal %48 {approx = true} : vector<1x8x1xf32> -> vector<1x8x1xf32>
    %50 = vector.broadcast %49 : vector<1x8x1xf32> to vector<1x8x8xf32>
    %51 = arith.mulf %46, %50 : vector<1x8x8xf32>
    "tpu.trace_start"() <{level = 10 : i32, message = "bqk,bkd->bqd"}> : () -> ()
    %cst_18 = arith.constant dense<0.000000e+00> : vector<1x8x64xf32>
    %52 = tpu.matmul %51, %39, %cst_18 {dimension_numbers = #tpu.dot_dimension_numbers<[2], [1], [1], [2], [0, 0, 0, 1, 1, 2], [0], [0]>} : vector<1x8x8xf32>, vector<1x8x64xf32>, vector<1x8x64xf32> -> vector<1x8x64xf32>
    "tpu.trace_stop"() : () -> ()
    %53 = vector.extract_strided_slice %11 {offsets = [0, 0, 128], sizes = [1, 8, 64], strides = [1, 1, 1]} : vector<1x8x384xf32> to vector<1x8x64xf32>
    %54 = vector.extract_strided_slice %12 {offsets = [0, 0, 128], sizes = [1, 8, 64], strides = [1, 1, 1]} : vector<1x8x384xf32> to vector<1x8x64xf32>
    %55 = vector.extract_strided_slice %13 {offsets = [0, 0, 128], sizes = [1, 8, 64], strides = [1, 1, 1]} : vector<1x8x384xf32> to vector<1x8x64xf32>
    "tpu.trace_start"() <{level = 10 : i32, message = "bqd,bkd->bqk"}> : () -> ()
    %cst_19 = arith.constant dense<0.000000e+00> : vector<1x8x8xf32>
    %56 = tpu.matmul %53, %54, %cst_19 {dimension_numbers = #tpu.dot_dimension_numbers<[2], [2], [1], [1], [0, 0, 0, 1, 1, 1], [0], [0]>} : vector<1x8x64xf32>, vector<1x8x64xf32>, vector<1x8x8xf32> -> vector<1x8x8xf32>
    "tpu.trace_stop"() : () -> ()
    %57 = arith.addf %56, %20 : vector<1x8x8xf32>
    %cst_20 = arith.constant dense<0xFF800000> : vector<1x8xf32>
    %58 = vector.multi_reduction <maximumf>, %57, %cst_20 [2] : vector<1x8x8xf32> to vector<1x8xf32>
    %59 = vector.shape_cast %58 : vector<1x8xf32> to vector<1x8x1xf32>
    %60 = vector.broadcast %59 : vector<1x8x1xf32> to vector<1x8x8xf32>
    %61 = arith.subf %57, %60 : vector<1x8x8xf32>
    %62 = math.exp %61 : vector<1x8x8xf32>
    %cst_21 = arith.constant dense<0.000000e+00> : vector<1x8xf32>
    %63 = vector.multi_reduction <add>, %62, %cst_21 [2] : vector<1x8x8xf32> to vector<1x8xf32>
    %64 = vector.shape_cast %63 : vector<1x8xf32> to vector<1x8x1xf32>
    %65 = tpu.reciprocal %64 {approx = true} : vector<1x8x1xf32> -> vector<1x8x1xf32>
    %66 = vector.broadcast %65 : vector<1x8x1xf32> to vector<1x8x8xf32>
    %67 = arith.mulf %62, %66 : vector<1x8x8xf32>
    "tpu.trace_start"() <{level = 10 : i32, message = "bqk,bkd->bqd"}> : () -> ()
    %cst_22 = arith.constant dense<0.000000e+00> : vector<1x8x64xf32>
    %68 = tpu.matmul %67, %55, %cst_22 {dimension_numbers = #tpu.dot_dimension_numbers<[2], [1], [1], [2], [0, 0, 0, 1, 1, 2], [0], [0]>} : vector<1x8x8xf32>, vector<1x8x64xf32>, vector<1x8x64xf32> -> vector<1x8x64xf32>
    "tpu.trace_stop"() : () -> ()
    %69 = vector.extract_strided_slice %11 {offsets = [0, 0, 192], sizes = [1, 8, 64], strides = [1, 1, 1]} : vector<1x8x384xf32> to vector<1x8x64xf32>
    %70 = vector.extract_strided_slice %12 {offsets = [0, 0, 192], sizes = [1, 8, 64], strides = [1, 1, 1]} : vector<1x8x384xf32> to vector<1x8x64xf32>
    %71 = vector.extract_strided_slice %13 {offsets = [0, 0, 192], sizes = [1, 8, 64], strides = [1, 1, 1]} : vector<1x8x384xf32> to vector<1x8x64xf32>
    "tpu.trace_start"() <{level = 10 : i32, message = "bqd,bkd->bqk"}> : () -> ()
    %cst_23 = arith.constant dense<0.000000e+00> : vector<1x8x8xf32>
    %72 = tpu.matmul %69, %70, %cst_23 {dimension_numbers = #tpu.dot_dimension_numbers<[2], [2], [1], [1], [0, 0, 0, 1, 1, 1], [0], [0]>} : vector<1x8x64xf32>, vector<1x8x64xf32>, vector<1x8x8xf32> -> vector<1x8x8xf32>
    "tpu.trace_stop"() : () -> ()
    %73 = arith.addf %72, %20 : vector<1x8x8xf32>
    %cst_24 = arith.constant dense<0xFF800000> : vector<1x8xf32>
    %74 = vector.multi_reduction <maximumf>, %73, %cst_24 [2] : vector<1x8x8xf32> to vector<1x8xf32>
    %75 = vector.shape_cast %74 : vector<1x8xf32> to vector<1x8x1xf32>
    %76 = vector.broadcast %75 : vector<1x8x1xf32> to vector<1x8x8xf32>
    %77 = arith.subf %73, %76 : vector<1x8x8xf32>
    %78 = math.exp %77 : vector<1x8x8xf32>
    %cst_25 = arith.constant dense<0.000000e+00> : vector<1x8xf32>
    %79 = vector.multi_reduction <add>, %78, %cst_25 [2] : vector<1x8x8xf32> to vector<1x8xf32>
    %80 = vector.shape_cast %79 : vector<1x8xf32> to vector<1x8x1xf32>
    %81 = tpu.reciprocal %80 {approx = true} : vector<1x8x1xf32> -> vector<1x8x1xf32>
    %82 = vector.broadcast %81 : vector<1x8x1xf32> to vector<1x8x8xf32>
    %83 = arith.mulf %78, %82 : vector<1x8x8xf32>
    "tpu.trace_start"() <{level = 10 : i32, message = "bqk,bkd->bqd"}> : () -> ()
    %cst_26 = arith.constant dense<0.000000e+00> : vector<1x8x64xf32>
    %84 = tpu.matmul %83, %71, %cst_26 {dimension_numbers = #tpu.dot_dimension_numbers<[2], [1], [1], [2], [0, 0, 0, 1, 1, 2], [0], [0]>} : vector<1x8x8xf32>, vector<1x8x64xf32>, vector<1x8x64xf32> -> vector<1x8x64xf32>
    "tpu.trace_stop"() : () -> ()
    %85 = vector.extract_strided_slice %11 {offsets = [0, 0, 256], sizes = [1, 8, 64], strides = [1, 1, 1]} : vector<1x8x384xf32> to vector<1x8x64xf32>
    %86 = vector.extract_strided_slice %12 {offsets = [0, 0, 256], sizes = [1, 8, 64], strides = [1, 1, 1]} : vector<1x8x384xf32> to vector<1x8x64xf32>
    %87 = vector.extract_strided_slice %13 {offsets = [0, 0, 256], sizes = [1, 8, 64], strides = [1, 1, 1]} : vector<1x8x384xf32> to vector<1x8x64xf32>
    "tpu.trace_start"() <{level = 10 : i32, message = "bqd,bkd->bqk"}> : () -> ()
    %cst_27 = arith.constant dense<0.000000e+00> : vector<1x8x8xf32>
    %88 = tpu.matmul %85, %86, %cst_27 {dimension_numbers = #tpu.dot_dimension_numbers<[2], [2], [1], [1], [0, 0, 0, 1, 1, 1], [0], [0]>} : vector<1x8x64xf32>, vector<1x8x64xf32>, vector<1x8x8xf32> -> vector<1x8x8xf32>
    "tpu.trace_stop"() : () -> ()
    %89 = arith.addf %88, %20 : vector<1x8x8xf32>
    %cst_28 = arith.constant dense<0xFF800000> : vector<1x8xf32>
    %90 = vector.multi_reduction <maximumf>, %89, %cst_28 [2] : vector<1x8x8xf32> to vector<1x8xf32>
    %91 = vector.shape_cast %90 : vector<1x8xf32> to vector<1x8x1xf32>
    %92 = vector.broadcast %91 : vector<1x8x1xf32> to vector<1x8x8xf32>
    %93 = arith.subf %89, %92 : vector<1x8x8xf32>
    %94 = math.exp %93 : vector<1x8x8xf32>
    %cst_29 = arith.constant dense<0.000000e+00> : vector<1x8xf32>
    %95 = vector.multi_reduction <add>, %94, %cst_29 [2] : vector<1x8x8xf32> to vector<1x8xf32>
    %96 = vector.shape_cast %95 : vector<1x8xf32> to vector<1x8x1xf32>
    %97 = tpu.reciprocal %96 {approx = true} : vector<1x8x1xf32> -> vector<1x8x1xf32>
    %98 = vector.broadcast %97 : vector<1x8x1xf32> to vector<1x8x8xf32>
    %99 = arith.mulf %94, %98 : vector<1x8x8xf32>
    "tpu.trace_start"() <{level = 10 : i32, message = "bqk,bkd->bqd"}> : () -> ()
    %cst_30 = arith.constant dense<0.000000e+00> : vector<1x8x64xf32>
    %100 = tpu.matmul %99, %87, %cst_30 {dimension_numbers = #tpu.dot_dimension_numbers<[2], [1], [1], [2], [0, 0, 0, 1, 1, 2], [0], [0]>} : vector<1x8x8xf32>, vector<1x8x64xf32>, vector<1x8x64xf32> -> vector<1x8x64xf32>
    "tpu.trace_stop"() : () -> ()
    %101 = vector.extract_strided_slice %11 {offsets = [0, 0, 320], sizes = [1, 8, 64], strides = [1, 1, 1]} : vector<1x8x384xf32> to vector<1x8x64xf32>
    %102 = vector.extract_strided_slice %12 {offsets = [0, 0, 320], sizes = [1, 8, 64], strides = [1, 1, 1]} : vector<1x8x384xf32> to vector<1x8x64xf32>
    %103 = vector.extract_strided_slice %13 {offsets = [0, 0, 320], sizes = [1, 8, 64], strides = [1, 1, 1]} : vector<1x8x384xf32> to vector<1x8x64xf32>
    "tpu.trace_start"() <{level = 10 : i32, message = "bqd,bkd->bqk"}> : () -> ()
    %cst_31 = arith.constant dense<0.000000e+00> : vector<1x8x8xf32>
    %104 = tpu.matmul %101, %102, %cst_31 {dimension_numbers = #tpu.dot_dimension_numbers<[2], [2], [1], [1], [0, 0, 0, 1, 1, 1], [0], [0]>} : vector<1x8x64xf32>, vector<1x8x64xf32>, vector<1x8x8xf32> -> vector<1x8x8xf32>
    "tpu.trace_stop"() : () -> ()
    %105 = arith.addf %104, %20 : vector<1x8x8xf32>
    %cst_32 = arith.constant dense<0xFF800000> : vector<1x8xf32>
    %106 = vector.multi_reduction <maximumf>, %105, %cst_32 [2] : vector<1x8x8xf32> to vector<1x8xf32>
    %107 = vector.shape_cast %106 : vector<1x8xf32> to vector<1x8x1xf32>
    %108 = vector.broadcast %107 : vector<1x8x1xf32> to vector<1x8x8xf32>
    %109 = arith.subf %105, %108 : vector<1x8x8xf32>
    %110 = math.exp %109 : vector<1x8x8xf32>
    %cst_33 = arith.constant dense<0.000000e+00> : vector<1x8xf32>
    %111 = vector.multi_reduction <add>, %110, %cst_33 [2] : vector<1x8x8xf32> to vector<1x8xf32>
    %112 = vector.shape_cast %111 : vector<1x8xf32> to vector<1x8x1xf32>
    %113 = tpu.reciprocal %112 {approx = true} : vector<1x8x1xf32> -> vector<1x8x1xf32>
    %114 = vector.broadcast %113 : vector<1x8x1xf32> to vector<1x8x8xf32>
    %115 = arith.mulf %110, %114 : vector<1x8x8xf32>
    "tpu.trace_start"() <{level = 10 : i32, message = "bqk,bkd->bqd"}> : () -> ()
    %cst_34 = arith.constant dense<0.000000e+00> : vector<1x8x64xf32>
    %116 = tpu.matmul %115, %103, %cst_34 {dimension_numbers = #tpu.dot_dimension_numbers<[2], [1], [1], [2], [0, 0, 0, 1, 1, 2], [0], [0]>} : vector<1x8x8xf32>, vector<1x8x64xf32>, vector<1x8x64xf32> -> vector<1x8x64xf32>
    "tpu.trace_stop"() : () -> ()
    %117 = tpu.concatenate %36, %52, %68, %84, %100, %116 in 2 : vector<1x8x64xf32>, vector<1x8x64xf32>, vector<1x8x64xf32>, vector<1x8x64xf32>, vector<1x8x64xf32>, vector<1x8x64xf32> -> vector<1x8x384xf32>
    %118 = vector.shape_cast %117 : vector<1x8x384xf32> to vector<8x384xf32>
    %c0_35 = arith.constant 0 : index
    %c0_36 = arith.constant 0 : index
    %119 = vector.load %arg3[%c0_35, %c0_36] : memref<384x384xbf16, #tpu.memory_space<vmem>>, vector<384x384xbf16>
    %120 = arith.extf %119 : vector<384x384xbf16> to vector<384x384xf32>
    %cst_37 = arith.constant dense<0.000000e+00> : vector<8x384xf32>
    %121 = tpu.matmul %118, %120, %cst_37 {dimension_numbers = #tpu.dot_dimension_numbers<[1], [0], [0], [1], [0, 0, 1, 1], [], []>} : vector<8x384xf32>, vector<384x384xf32>, vector<8x384xf32> -> vector<8x384xf32>
    %c0_38 = arith.constant 0 : index
    %c0_39 = arith.constant 0 : index
    %122 = vector.load %arg4[%c0_38, %c0_39] : memref<1x384xf32, #tpu.memory_space<vmem>>, vector<1x384xf32>
    %123 = vector.broadcast %122 : vector<1x384xf32> to vector<8x384xf32>
    %124 = arith.addf %121, %123 : vector<8x384xf32>
    %125 = vector.shape_cast %124 : vector<8x384xf32> to vector<1x8x384xf32>
    %c0_40 = arith.constant 0 : index
    %c0_41 = arith.constant 0 : index
    %c0_42 = arith.constant 0 : index
    %126 = vector.load %arg5[%c0_40, %c0_41, %c0_42] : memref<1x8x384xf32, #tpu.memory_space<vmem>>, vector<1x8x384xf32>
    tpu.vector_store %arg5[%c0_40, %c0_41, %c0_42], %125 {strides = array<i32>} : memref<1x8x384xf32, #tpu.memory_space<vmem>>, vector<1x8x384xf32>,
    return
  }
  func.func @transform_0(%arg0: i32) -> (i32, i32, i32) {
    %c0_i32 = arith.constant 0 : i32
    %c0_i32_0 = arith.constant 0 : i32
    %c0_i32_1 = arith.constant 0 : i32
    return %arg0, %c0_i32, %c0_i32_0 : i32, i32, i32
  }
  func.func @transform_1(%arg0: i32) -> (i32, i32) {
    %c0_i32 = arith.constant 0 : i32
    %c0_i32_0 = arith.constant 0 : i32
    %c0_i32_1 = arith.constant 0 : i32
    return %c0_i32, %c0_i32_0 : i32, i32
  }
  func.func @transform_2(%arg0: i32) -> (i32, i32) {
    %c0_i32 = arith.constant 0 : i32
    %c0_i32_0 = arith.constant 0 : i32
    %c0_i32_1 = arith.constant 0 : i32
    return %c0_i32, %c0_i32_0 : i32, i32
  }
  func.func @transform_3(%arg0: i32) -> (i32, i32) {
    %c0_i32 = arith.constant 0 : i32
    %c0_i32_0 = arith.constant 0 : i32
    %c0_i32_1 = arith.constant 0 : i32
    return %c0_i32, %c0_i32_0 : i32, i32
  }
  func.func @transform_4(%arg0: i32) -> (i32, i32, i32) {
    %c0_i32 = arith.constant 0 : i32
    %c0_i32_0 = arith.constant 0 : i32
    %c0_i32_1 = arith.constant 0 : i32
    return %arg0, %c0_i32, %c0_i32_0 : i32, i32, i32
  }
}

</mosaic_0001>

<bundles_post_ra>
// kernel: tpu_custom_call.1
= control target key start
LH: loop header
LB: loop body
LE: loop exit
PB: predicated region body
PF: predicated region fallthrough
CT: control target
= control target key end

     0   :  { %9 = vsyncpa [#allocation3], 0  ;;  %s5762_s0 = inlined_call_operand.hbm [shape: f32[2,8,384], index: 0, kind: input, shape index: {}]   ;;  %s5763_s1 = inlined_call_operand.hbm [shape: bf16[384,1152], index: 1, kind: input, shape index: {}]   ;;  %s5764_s2 = inlined_call_operand.hbm [shape: bf16[384,384], index: 2, kind: input, shape index: {}]   ;;  %s5765_s3 = inlined_call_operand.vmem [shape: f32[1,384], index: 3, kind: input, shape index: {}]   ;;  %s5766_s4 = inlined_call_operand.hbm [shape: f32[2,8,384], index: 4, kind: output, shape index: {}]  }
   0x1   :  { %11 = vsyncpa [#allocation3 + $0x1], 0 }
   0x2   :  { %12 = vsyncpa [#allocation6], 0 }
   0x3   :  { %13 = vsyncpa [#allocation4], 0 }
   0x4   :  { %15 = vsyncpa [#allocation4 + $0x1], 0  ;;  %s5327_s15 = smov 0   ;;  %s5329_s16 = smov 0  }
   0x5   :  { %s5331_s17 = smov 0   ;;  %s5333_s18 = smov 0  }
   0x6 LB: > { %s5348_s19 = sadd.s32 4294967295, %s5286_s18   ;;  %s3826_s20 = sadd.s32 4294967294, %s5286_s18   ;;  %s5286_s18 = sphi %s5333_s18, %s5786_s18   ;;  %s5282_s17 = sphi %s5331_s17, %s5785_s17   ;;  %s5278_s16 = sphi %s5329_s16, %s5784_s16   ;;  %s5274_s15 = sphi %s5327_s15, %s5783_s15  }
   0x7   : > { %p41_p0 = scmp.ne.s32.totalorder %s5278_s16, %s5274_s15  ;;  %p5767_p1 = scmp.eq.s32.totalorder %s5348_s19, 0 }
   0x8   : > { %p134_p3 = scmp.eq.s32.totalorder %s3826_s20, 1  ;;  %p3827_p5 = scmp.ge.s32.totalorder %s5286_s18, 1 }
   0x9   : > { %p5357_p4 = por %p5767_p1, %p41_p0  ;;  %p141_p7 = scmp.lt.s32.totalorder %s5286_s18, 3 }
   0xa   : > { %p5362_p6 = por %p134_p3, %p41_p0  ;;  %s5288_s24 = smov [#allocation5]  }
   0xb   : > { %s5770_s21 = scalar_select %p5357_p4, 1, 0 }
   0xc   : > { %s5771_s22 = scalar_select %p5362_p6, 1, 0 }
   0xd   : > { %p5367_p8 = pnand %p3827_p5, %p141_p7  ;;  %s153_s25 = sshll.u32 %s5288_s24, 4  ;;  %s5371_s25 = int_to_ptr.vmem [resolvable:$true] %s153_s25 }
   0xe   : > { %s5289_s27 = smov [#allocation7]   ;;  %s5130_s5 = scalar_lea.hbm %s5763_s1, 27648 }
   0xf   : > { %p4652_p9 = pneg %p5367_p8  ;;  %s166_s28 = sshll.u32 %s5289_s27, 4  ;;  %s5382_s28 = int_to_ptr.vmem [resolvable:$true] %s166_s28 }
  0x10   : > { %p5131_p12 = scmp.ne.s32.totalorder %s5763_s1, %s5130_s5  ;;  %p5137_p5 = scmp.lt.u32.totalorder %s5130_s5, %s5763_s1 }
  0x11   : > { %p5378_p11 = pnand %p4652_p9, %p5767_p1 }
  0x13   : > { %p5132_p13 = pneg %p5378_p11 }
  0x15   : > { %p5133_p0 = pnand %p5132_p13, %p5131_p12 }
  0x17   : > { %p5134_p3 = pneg %p5133_p0 }
  0x19   : > { %p5139_p7 = pnand %p5137_p5, %p5134_p3 }
  0x1b   : > { %5142 = shalt.err (!%p5139_p7)
}
  0x1c   : > { %s5143_s10 = scalar_lea.vmem %s5371_s25, 27648  ;;  %p5151_p2 = scmp.lt.s32.totalorder %s5371_s25, %s5371_s25 }
  0x1d   : > { %p5144_p9 = scmp.ne.s32.totalorder %s5371_s25, %s5143_s10  ;;  %p5152_p12 = scmp.lt.s32.totalorder %s5143_s10, %s5143_s10 }
  0x1f   : > { %p5146_p10 = pnand %p5144_p9, %p5132_p13  ;;  %p5153_p0 = por %p5152_p12, %p5151_p2 }
  0x21   : > { %p5147_p1 = pneg %p5146_p10 }
  0x23   : > { %p5154_p6 = pnand %p5153_p0, %p5147_p1 }
  0x25   : > { %5157 = shalt.err (!%p5154_p6)
}
  0x26   : > { %s5290_s11 = smov 576   ;;  %s5291_s12 = smov 36  }
  0x27   : > { %4655 = dma.hbm_to_vmem [thread:$0]  (!%p5378_p11), %s5763_s1, 27648, %s5371_s25, [#allocation6], %s5290_s11, %s5290_s11, %s5291_s12  }
  0x28   : > { %s5158_s27 = scalar_lea.hbm %s5764_s2, 9216 }
  0x29   : > { %p5159_p2 = scmp.ne.s32.totalorder %s5764_s2, %s5158_s27  ;;  %p5165_p10 = scmp.lt.u32.totalorder %s5158_s27, %s5764_s2 }
  0x2b   : > { %p5161_p1 = pnand %p5159_p2, %p5132_p13 }
  0x2d   : > { %p5162_p6 = pneg %p5161_p1 }
  0x2f   : > { %p5167_p3 = pnand %p5165_p10, %p5162_p6 }
  0x31   : > { %5170 = shalt.err (!%p5167_p3)
}
  0x32   : > { %s5171_s25 = scalar_lea.vmem %s5382_s28, 9216  ;;  %p5179_p12 = scmp.lt.s32.totalorder %s5382_s28, %s5382_s28 }
  0x33   : > { %p5172_p5 = scmp.ne.s32.totalorder %s5382_s28, %s5171_s25  ;;  %p5180_p0 = scmp.lt.s32.totalorder %s5171_s25, %s5171_s25 }
  0x35   : > { %p5174_p7 = pnand %p5172_p5, %p5132_p13  ;;  %p5181_p2 = por %p5180_p0, %p5179_p12 }
  0x37   : > { %p5175_p9 = pneg %p5174_p7 }
  0x39   : > { %p5182_p1 = pnand %p5181_p2, %p5175_p9 }
  0x3b   : > { %5185 = shalt.err (!%p5182_p1)
}
  0x3c   : > { %s5292_s7 = smov 192   ;;  %s5293_s8 = smov 12  }
  0x3d   : > { %4658 = dma.hbm_to_vmem [thread:$0]  (!%p5378_p11), %s5764_s2, 9216, %s5382_s28, [#allocation6], %s5292_s7, %s5292_s7, %s5293_s8  }
  0x3e   : > { %s5437_s11 = sadd.s32 1, %s5286_s18   ;;  %s28_s13 = sadd.s32 1, %s5282_s17 }
  0x3f   : > { %s25_s12 = ssub.s32 %s5286_s18, %s5437_s11  ;;  %p35_p6 = scmp.ne.s32.totalorder %s5282_s17, %s5278_s16 }
  0x40   : > { %p26_p13 = scmp.eq.s32.totalorder %s25_s12, 0  ;;  %p36_p10 = scmp.eq.s32.totalorder %s5286_s18, 0 }
  0x41   : > { %p5774_p5 = scmp.eq.s32.totalorder %s5348_s19, 1  ;;  %p4669_p9 = scmp.lt.s32.totalorder %s5286_s18, 2 }
  0x42   : > { %s5446_s14 = scalar_select %p26_p13, %s5282_s17, %s28_s13  }
  0x43   : > { %p37_p3 = por %p36_p10, %p35_p6  ;;  %p5450_p7 = por %p5774_p5, %p35_p6 }
  0x44   : > { %s183_s26 = sand.u32 1, %s5282_s17   ;;  %s4637_s28 = smul.u32 384, %s5286_s18 }
  0x45   : > { %s5775_s20 = scalar_select %p5450_p7, 1, 0 }
  0x46   : > { %s4636_s24 = smul.u32 24, %s183_s26  ;;  %p5457_p11 = pnand %p4669_p9, %p37_p3 }
  0x47   : > { %s5464_s5 = scalar_lea.hbm %s5762_s0, %s4637_s28  ;;  %s184_s7 = scalar_lea.sflag [#allocation3], %s183_s26 }
  0x48   : > { %s187_s6 = scalar_lea.vmem [#allocation2], %s4636_s24  ;;  %s5186_s8 = scalar_lea.hbm %s5464_s5, 384 }
  0x49   : > { %s195_s25 = sshll.u32 %s187_s6, 4  ;;  %p5187_p12 = scmp.ne.s32.totalorder %s5464_s5, %s5186_s8  ;;  %s5466_s25 = int_to_ptr.vmem [resolvable:$true] %s195_s25 }
  0x4a   : > { %p5188_p0 = pneg %p5457_p11  ;;  %s5191_s12 = scalar_lea.hbm %s5762_s0, 768 }
  0x4b   : > { %p5192_p13 = scmp.lt.u32.totalorder %s5464_s5, %s5762_s0  ;;  %p5193_p6 = scmp.lt.u32.totalorder %s5191_s12, %s5186_s8 }
  0x4c   : > { %p5189_p2 = pnand %p5188_p0, %p5187_p12  ;;  %p5195_p3 = scmp.lt.u32.totalorder %s5186_s8, %s5464_s5 }
  0x4d   : > { %p5194_p10 = por %p5193_p6, %p5192_p13 }
  0x4e   : > { %p5190_p1 = pneg %p5189_p2 }
  0x4f   : > { %p5196_p5 = por %p5195_p3, %p5194_p10 }
  0x51   : > { %p5197_p9 = pnand %p5196_p5, %p5190_p1 }
  0x53   : > { %5200 = shalt.err (!%p5197_p9)
}
  0x54   : > { %s5201_s26 = scalar_lea.vmem %s5466_s25, 384  ;;  %s5294_s24 = smov [#allocation2]  }
  0x55   : > { %p5202_p12 = scmp.ne.s32.totalorder %s5466_s25, %s5201_s26  ;;  %s5206_s29 = sshll.u32 %s5294_s24, 4  ;;  %s5207_s29 = int_to_ptr.vmem [resolvable:$false] %s5206_s29 }
  0x56   : > { %s5208_s30 = scalar_lea.vmem %s5207_s29, 768  ;;  %p5209_p4 = scmp.lt.s32.totalorder %s5466_s25, %s5207_s29 }
  0x57   : > { %p5204_p2 = pnand %p5202_p12, %p5188_p0  ;;  %p5210_p13 = scmp.lt.s32.totalorder %s5208_s30, %s5201_s26 }
  0x59   : > { %p5205_p7 = pneg %p5204_p2  ;;  %p5211_p6 = por %p5210_p13, %p5209_p4 }
  0x5b   : > { %p5212_p10 = pnand %p5211_p6, %p5205_p7 }
  0x5d   : > { %5215 = shalt.err (!%p5212_p10)
}
  0x5e   : > { %4662 = dma.hbm_to_vmem [thread:$0]  (!%p5457_p11), %s5464_s5, 384, %s5466_s25, %s184_s7  }
  0x5f   : > { %204 = sbr.rel (%p5367_p8) target bundleno = 4227 (0x1083), region = 36  ;;  %s5496_s6 = sand.u32 (!%p5367_p8), 1, %s5278_s16  }
  0x60   : > { %s4638_s8 = smul.u32 (!%p5367_p8), 24, %s5496_s6  ;;  %s207_s9 = scalar_lea.sflag (!%p5367_p8), [#allocation3], %s5496_s6 }
  0x61   : > { %p5777_p4 = scmp.ne.s32.totalorder (!%p5367_p8), %s5770_s21, 0 }
  0x62   : > { %s5502_s10 = scalar_lea.vmem (!%p5367_p8), [#allocation2], %s4638_s8 }
  0x66   : > { %5261 = dma.done.wait (%p5777_p4), %s207_s9, 384  }
  0x67   : > { %5263 = vsyncadd (%p5777_p4), %s207_s9, 4294966912  ;;  %p5778_p7 = scmp.eq.s32.totalorder %s5348_s19, 0 }
  0x69   : > { %5265 = dma.done.wait (%p5778_p7), [#allocation6], 36864   ;;  %p5779_p8 = pmov %p5778_p7 }
  0x6a   : > { %v4722_v0 = vld [vmem:[#allocation5 + $0x248] ss:$36 sps:$4 sm:$0xff]   ;;  %v4724_v2 = vld [vmem:[#allocation5 + $0x290] ss:$36 sps:$4 sm:$0xff]   ;;  %v4726_v4 = vld [vmem:[#allocation5 + $0x2d8] ss:$36 sps:$4 sm:$0xff]  }
  0x6b   : > { %5267 = vsyncadd (%p5779_p8), [#allocation6], 4294930432  ;;  %v4723_v1 = vld [vmem:[#allocation5 + $0x8] ss:$36 sps:$4 sm:$0xff]   ;;  %4072 = vmatprep.subr.bf16.mxu1 %v4722_v0  ;;  %v4725_v3 = vld [vmem:[#allocation5 + $0x50] ss:$36 sps:$4 sm:$0xff]  }
  0x6c   : > { %4073 = vmatpush3.bf16.msra.mxu1 %v4723_v1  ;;  %v4727_v5 = vld [vmem:[#allocation5 + $0x98] ss:$36 sps:$4 sm:$0xff]   ;;  %v4728_v6 = vld [vmem:[#allocation5 + $0x320] ss:$36 sps:$4 sm:$0xff]   ;;  %v4730_v8 = vld [vmem:[#allocation5 + $0x368] ss:$36 sps:$4 sm:$0xff]  }
  0x6d   : > { %4074 = vmatprep.subr.bf16.mxu1 %v4724_v2  ;;  %v4729_v7 = vld [vmem:[#allocation5 + $0xe0] ss:$36 sps:$4 sm:$0xff]   ;;  %v4731_v9 = vld [vmem:[#allocation5 + $0x128] ss:$36 sps:$4 sm:$0xff]   ;;  %v4732_v10 = vld [vmem:[#allocation5 + $0x3b0] ss:$36 sps:$4 sm:$0xff]  }
  0x6e   : > { %v245_v11 = vld [vmem:[%s5502_s10 + $0x8] sm:$0xff]  ;;  %v4739_v14 = vld [vmem:[#allocation5 + $0x4] ss:$36 sps:$4 sm:$0xff]   ;;  %v5295_v30 = vmov 0.0   ;;  %vm5296_vm0 = vmmov 0   ;;  %vm2185_vm1 = vcmask 523264  }
  0x6f   : > { %v4733_v12 = vld [vmem:[#allocation5 + $0x170] ss:$36 sps:$4 sm:$0xff]   ;;  %v5513_v13 = vpack.c.bf16 %v245_v11, %v245_v11  ;;  %v4741_v15 = vld [vmem:[#allocation5] ss:$36 sps:$4 sm:$0xff]   ;;  %v4734_v16 = vld [vmem:[#allocation5 + $0x3f8] ss:$36 sps:$4 sm:$0xff]   ;;  %730 = vmatprep.subr.bf16.mxu0 %v4739_v14 }
  0x70   : > { %4075 = vmatpush3.bf16.msra.mxu1 %v4725_v3  ;;  %v4743_v17 = vld [vmem:[#allocation5 + $0x4c] ss:$36 sps:$4 sm:$0xff]   ;;  %731 = vmatpush1.bf16.msra.mxu0 %v4741_v15  ;;  %v4735_v19 = vld [vmem:[#allocation5 + $0x1b8] ss:$36 sps:$4 sm:$0xff]   ;;  %v4736_v21 = vld [vmem:[#allocation5 + $0x440] ss:$36 sps:$4 sm:$0xff]  }
  0x71   : > { %4076 = vmatprep.subr.bf16.mxu1 %v4726_v4  ;;  %844 = vmatprep.mubr.bf16.mxu1 %v5513_v13  ;;  %v4745_v18 = vld [vmem:[#allocation5 + $0x48] ss:$36 sps:$4 sm:$0xff]   ;;  %v4747_v20 = vld [vmem:[#allocation5 + $0x94] ss:$36 sps:$4 sm:$0xff]   ;;  %v4737_v22 = vld [vmem:[#allocation5 + $0x200] ss:$36 sps:$4 sm:$0xff]  }
  0x72   : > { %762 = vmatprep.mubr.bf16.mxu0 %v5513_v13  ;;  %732 = vmatprep.subr.bf16.mxu0 %v4743_v17  ;;  %v4749_v23 = vld [vmem:[#allocation5 + $0x90] ss:$36 sps:$4 sm:$0xff]   ;;  %v4751_v24 = vld [vmem:[#allocation5 + $0xdc] ss:$36 sps:$4 sm:$0xff]   ;;  %v4755_v28 = vld [vmem:[#allocation5 + $0x124] ss:$36 sps:$4 sm:$0xff]  }
  0x73   : > { %v244_v25 = vld [vmem:[%s5502_s10] sm:$0xff]  ;;  %v4753_v26 = vld [vmem:[#allocation5 + $0xd8] ss:$36 sps:$4 sm:$0xff]   ;;  %v4757_v31 = vld [vmem:[#allocation5 + $0x120] ss:$36 sps:$4 sm:$0xff]   ;;  %v5297_v17 = vmov 0  }
  0x74   : > { %4077 = vmatpush3.bf16.msra.mxu1 %v4727_v5  ;;  %733 = vmatpush1.bf16.msra.mxu0 %v4745_v18  ;;  %v5518_v27 = vpack.c.bf16 %v244_v25, %v244_v25  ;;  %v4738_v29 = vld [vmem:[#allocation5 + $0x488] ss:$36 sps:$4 sm:$0xff]   ;;  %v4742_v33 = vld [vmem:[#allocation5 + $0x4d0] ss:$36 sps:$4 sm:$0xff]   ;;  %v4746_v36 = vld [vmem:[#allocation5 + $0x518] ss:$36 sps:$4 sm:$0xff]  }
  0x75   : > { %4078 = vmatprep.subr.bf16.mxu1 %v4728_v6  ;;  %734 = vmatprep.subr.bf16.mxu0 %v4747_v20  ;;  %v4759_v32 = vld [vmem:[#allocation5 + $0x16c] ss:$36 sps:$4 sm:$0xff]   ;;  %v4763_v35 = vld [vmem:[#allocation5 + $0x1b4] ss:$36 sps:$4 sm:$0xff]   ;;  %v4767_v38 = vld [vmem:[#allocation5 + $0x1fc] ss:$36 sps:$4 sm:$0xff]  }
  0x76   : > { %v4761_v34 = vld [vmem:[#allocation5 + $0x168] ss:$36 sps:$4 sm:$0xff]   ;;  %v4765_v37 = vld [vmem:[#allocation5 + $0x1b0] ss:$36 sps:$4 sm:$0xff]   ;;  %v4750_v39 = vld [vmem:[#allocation5 + $0x560] ss:$36 sps:$4 sm:$0xff]  }
  0x77   : > { %v4772_v40 = vld [vmem:[#allocation5 + $0x1f8] ss:$36 sps:$4 sm:$0xff]   ;;  %v4773_v41 = vld [vmem:[#allocation5 + $0x244] ss:$36 sps:$4 sm:$0xff]   ;;  %v4779_v44 = vld [vmem:[#allocation5 + $0x28c] ss:$36 sps:$4 sm:$0xff]  }
  0x78   : > { %4079 = vmatpush3.bf16.msra.mxu1 %v4729_v7  ;;  %735 = vmatpush1.bf16.msra.mxu0 %v4749_v23  ;;  %v4754_v42 = vld [vmem:[#allocation5 + $0x5a8] ss:$36 sps:$4 sm:$0xff]   ;;  %v4778_v43 = vld [vmem:[#allocation5 + $0x240] ss:$36 sps:$4 sm:$0xff]   ;;  %v4758_v45 = vld [vmem:[#allocation5 + $0x5f0] ss:$36 sps:$4 sm:$0xff]  }
  0x79   : > { %4080 = vmatprep.subr.bf16.mxu1 %v4730_v8  ;;  %736 = vmatprep.subr.bf16.mxu0 %v4751_v24  ;;  %v4784_v46 = vld [vmem:[#allocation5 + $0x288] ss:$36 sps:$4 sm:$0xff]   ;;  %v4785_v47 = vld [vmem:[#allocation5 + $0x2d4] ss:$36 sps:$4 sm:$0xff]   ;;  %v4791_v50 = vld [vmem:[#allocation5 + $0x31c] ss:$36 sps:$4 sm:$0xff]  }
  0x7a   : > { %v4762_v48 = vld [vmem:[#allocation5 + $0x638] ss:$36 sps:$4 sm:$0xff]   ;;  %v4790_v49 = vld [vmem:[#allocation5 + $0x2d0] ss:$36 sps:$4 sm:$0xff]   ;;  %v4766_v51 = vld [vmem:[#allocation5 + $0x680] ss:$36 sps:$4 sm:$0xff]  }
  0x7b   : > { %v246_v52 = vld [vmem:[%s5502_s10 + $0x10] sm:$0xff]  ;;  %v4771_v53 = vld [vmem:[#allocation5 + $0x10] ss:$36 sps:$4 sm:$0xff]   ;;  %v4808_v63 = vld [vmem:[#allocation5 + $0x3a8] ss:$36 sps:$4 sm:$0xff]   ;;  %s5298_s21 = smov 64  }
  0x7c   : > { %4081 = vmatpush3.bf16.msra.mxu1 %v4731_v9  ;;  %737 = vmatpush1.bf16.msra.mxu0 %v4753_v26  ;;  %v4796_v54 = vld [vmem:[#allocation5 + $0x318] ss:$36 sps:$4 sm:$0xff]   ;;  %v5532_v55 = vpack.c.bf16 %v246_v52, %v246_v52  ;;  %v4797_v56 = vld [vmem:[#allocation5 + $0x364] ss:$36 sps:$4 sm:$0xff]   ;;  %v4769_v57 = vld [vmem:[#allocation5 + $0xc] ss:$36 sps:$4 sm:$0xff]  }
  0x7d   : > { %4082 = vmatprep.subr.bf16.mxu1 %v4732_v10  ;;  %738 = vmatprep.subr.bf16.mxu0 %v4755_v28  ;;  %v4777_v58 = vld [vmem:[#allocation5 + $0x58] ss:$36 sps:$4 sm:$0xff]   ;;  %v4802_v59 = vld [vmem:[#allocation5 + $0x360] ss:$36 sps:$4 sm:$0xff]   ;;  %v4803_v60 = vld [vmem:[#allocation5 + $0x3ac] ss:$36 sps:$4 sm:$0xff]  }
  0x7e   : > { %v4775_v61 = vld [vmem:[#allocation5 + $0x54] ss:$36 sps:$4 sm:$0xff]   ;;  %v4783_v62 = vld [vmem:[#allocation5 + $0xa0] ss:$36 sps:$4 sm:$0xff]   ;;  %v4789_v2 = vld [vmem:[#allocation5 + $0xe8] ss:$36 sps:$4 sm:$0xff]  }
  0x7f   : > { %v4809_v0 = vld [vmem:[#allocation5 + $0x3f4] ss:$36 sps:$4 sm:$0xff]   ;;  %v4781_v1 = vld [vmem:[#allocation5 + $0x9c] ss:$36 sps:$4 sm:$0xff]   ;;  %v4787_v5 = vld [vmem:[#allocation5 + $0xe4] ss:$36 sps:$4 sm:$0xff]  }
  0x80   : > { %4083 = vmatpush3.bf16.msra.mxu1 %v4733_v12  ;;  %739 = vmatpush1.bf16.msra.mxu0 %v4757_v31  ;;  %v4814_v3 = vld [vmem:[#allocation5 + $0x3f0] ss:$36 sps:$4 sm:$0xff]   ;;  %v4815_v4 = vld [vmem:[#allocation5 + $0x43c] ss:$36 sps:$4 sm:$0xff]   ;;  %v4823_v8 = vld [vmem:[#allocation5 + $0x484] ss:$36 sps:$4 sm:$0xff]  }
  0x81   : > { %4084 = vmatprep.subr.bf16.mxu1 %v4734_v16  ;;  %740 = vmatprep.subr.bf16.mxu0 %v4759_v32  ;;  %v4795_v6 = vld [vmem:[#allocation5 + $0x130] ss:$36 sps:$4 sm:$0xff]   ;;  %v4820_v7 = vld [vmem:[#allocation5 + $0x438] ss:$36 sps:$4 sm:$0xff]   ;;  %v4821_v11 = vld [vmem:[#allocation5 + $0x480] ss:$36 sps:$4 sm:$0xff]  }
  0x82   : > { %v4793_v9 = vld [vmem:[#allocation5 + $0x12c] ss:$36 sps:$4 sm:$0xff]   ;;  %v4801_v10 = vld [vmem:[#allocation5 + $0x178] ss:$36 sps:$4 sm:$0xff]   ;;  %v4807_v15 = vld [vmem:[#allocation5 + $0x1c0] ss:$36 sps:$4 sm:$0xff]  }
  0x83   : > { %v4829_v12 = vld [vmem:[#allocation5 + $0x4cc] ss:$36 sps:$4 sm:$0xff]   ;;  %v4799_v14 = vld [vmem:[#allocation5 + $0x174] ss:$36 sps:$4 sm:$0xff]   ;;  %v4811_v23 = vld [vmem:[#allocation5 + $0x204] ss:$36 sps:$4 sm:$0xff]  }
  0x84   : > { %4085 = vmatpush3.bf16.msra.mxu1 %v4735_v19  ;;  %741 = vmatpush1.bf16.msra.mxu0 %v4761_v34  ;;  %v4827_v16 = vld [vmem:[#allocation5 + $0x4c8] ss:$36 sps:$4 sm:$0xff]   ;;  %v4835_v18 = vld [vmem:[#allocation5 + $0x514] ss:$36 sps:$4 sm:$0xff]   ;;  %v4805_v19 = vld [vmem:[#allocation5 + $0x1bc] ss:$36 sps:$4 sm:$0xff]  }
  0x85   : > { %4086 = vmatprep.subr.bf16.mxu1 %v4736_v21  ;;  %742 = vmatprep.subr.bf16.mxu0 %v4763_v35  ;;  %v4813_v20 = vld [vmem:[#allocation5 + $0x208] ss:$36 sps:$4 sm:$0xff]   ;;  %v4833_v21 = vld [vmem:[#allocation5 + $0x510] ss:$36 sps:$4 sm:$0xff]   ;;  %v4839_v25 = vld [vmem:[#allocation5 + $0x558] ss:$36 sps:$4 sm:$0xff]  }
  0x86   : > { %v4819_v24 = vld [vmem:[#allocation5 + $0x250] ss:$36 sps:$4 sm:$0xff]   ;;  %v4847_v26 = vld [vmem:[#allocation5 + $0x5a4] ss:$36 sps:$4 sm:$0xff]   ;;  %vm2262_vm3 = vcmask 64512   ;;  %s4639_s5 = smul.u32 384, %s5348_s19 }
  0x87   : > { %v4817_v28 = vld [vmem:[#allocation5 + $0x24c] ss:$36 sps:$4 sm:$0xff]   ;;  %v4845_v31 = vld [vmem:[#allocation5 + $0x5a0] ss:$36 sps:$4 sm:$0xff]   ;;  %s242_s25 = scalar_lea.vmem [#allocation8], %s4638_s8  ;;  %s3723_s19 = scalar_lea.sflag [#allocation4], %s5496_s6 }
  0x88   : > { %4087 = vmatpush3.bf16.msra.mxu1 %v4737_v22  ;;  %743 = vmatpush1.bf16.msra.mxu0 %v4765_v37  ;;  %v4841_v22 = vld [vmem:[#allocation5 + $0x55c] ss:$36 sps:$4 sm:$0xff]   ;;  %v4853_v32 = vld [vmem:[#allocation5 + $0x5ec] ss:$36 sps:$4 sm:$0xff]   ;;  %s3737_s7 = sshll.u32 %s242_s25, 4  ;;  %s5718_s28 = scalar_lea.hbm %s5766_s4, %s4639_s5  ;;  %s5720_s7 = int_to_ptr.vmem [resolvable:$true] %s3737_s7 }
  0x89   : > { %4241 = vmatprep.subr.bf16.mxu1 %v5295_v30  ;;  %744 = vmatprep.subr.bf16.mxu0 %v4767_v38  ;;  %v4832_v34 = vld [vmem:[#allocation5 + $0x2e0] ss:$36 sps:$4 sm:$0xff]   ;;  %v4851_v35 = vld [vmem:[#allocation5 + $0x5e8] ss:$36 sps:$4 sm:$0xff]   ;;  %s5216_s26 = scalar_lea.vmem %s5720_s7, 384  ;;  %p5780_p0 = scmp.ne.s32.totalorder %s5775_s20, 0 }
  0x8a   : > { %v4830_v37 = vld [vmem:[#allocation5 + $0x2dc] ss:$36 sps:$4 sm:$0xff]   ;;  %v4838_v38 = vld [vmem:[#allocation5 + $0x328] ss:$36 sps:$4 sm:$0xff]   ;;  %p5217_p11 = scmp.ne.s32.totalorder %s5720_s7, %s5216_s26  ;;  %s5301_s24 = smov [#allocation8]  }
  0x8b   : > { %845 = vmatmul.mubr.bf16.vlgmr.msra.gmra.mrb[0].mxu1 %v5518_v27  ;;  %v4866_v52 = vld [vmem:[#allocation5 + $0x48c] ss:$36 sps:$4 sm:$0xff]   ;;  %s5220_s29 = sshll.u32 %s5301_s24, 4  ;;  %s5221_s29 = int_to_ptr.vmem [resolvable:$false] %s5220_s29 }
  0x8c   : > { %4242 = vmatpush3.bf16.msra.mxu1 %v4738_v29  ;;  %4257 = vmatprep.mubr.msk.bf16.mxu1 %vm5296_vm0, %v5295_v30  ;;  %v4826_v29 = vld [vmem:[#allocation5 + $0x298] ss:$36 sps:$4 sm:$0xff]   ;;  %p5218_p1 = pnand %p5217_p11, %p5780_p0  ;;  %s5222_s30 = scalar_lea.vmem %s5221_s29, 768 }
  0x8d   : > { %4243 = vmatprep.subr.bf16.mxu1 %v5295_v30  ;;  %745 = vmatpush1.bf16.msra.mxu0 %v4772_v40  ;;  %v4865_v40 = vld [vmem:[#allocation5 + $0x67c] ss:$36 sps:$4 sm:$0xff]   ;;  %p5223_p5 = scmp.lt.s32.totalorder %s5720_s7, %s5221_s29  ;;  %p5224_p9 = scmp.lt.s32.totalorder %s5222_s30, %s5216_s26 }
  0x8e   : > { %746 = vmatprep.subr.bf16.mxu0 %v4773_v41  ;;  %v4836_v41 = vld [vmem:[#allocation5 + $0x324] ss:$36 sps:$4 sm:$0xff]   ;;  %p5219_p3 = pneg %p5218_p1 }
  0x8f   : > { %p5225_p12 = por %p5224_p9, %p5223_p5 }
  0x90   : > { %4244 = vmatpush3.bf16.msra.mxu1 %v4742_v33  ;;  %v4824_v33 = vld [vmem:[#allocation5 + $0x294] ss:$36 sps:$4 sm:$0xff]  }
  0x91   : > { %4245 = vmatprep.subr.bf16.mxu1 %v5295_v30  ;;  %747 = vmatpush1.bf16.msra.mxu0 %v4778_v43  ;;  %v4863_v43 = vld [vmem:[#allocation5 + $0x678] ss:$36 sps:$4 sm:$0xff]   ;;  %p5226_p2 = pnand %p5225_p12, %p5219_p3 }
  0x92   : > { %748 = vmatprep.subr.bf16.mxu0 %v4779_v44  ;;  %v4842_v44 = vld [vmem:[#allocation5 + $0x36c] ss:$36 sps:$4 sm:$0xff]  }
  0x94   : > { %4246 = vmatpush3.bf16.msra.mxu1 %v4746_v36  ;;  %v4859_v36 = vld [vmem:[#allocation5 + $0x634] ss:$36 sps:$4 sm:$0xff]  }
  0x95   : > { %4247 = vmatprep.subr.bf16.mxu1 %v5295_v30  ;;  %749 = vmatpush1.bf16.msra.mxu0 %v4784_v46  ;;  %v4848_v46 = vld [vmem:[#allocation5 + $0x3b4] ss:$36 sps:$4 sm:$0xff]  }
  0x96   : > { %750 = vmatprep.subr.bf16.mxu0 %v4785_v47  ;;  %v4856_v47 = vld [vmem:[#allocation5 + $0x400] ss:$36 sps:$4 sm:$0xff]  }
  0x98   : > { %4248 = vmatpush3.bf16.msra.mxu1 %v4750_v39  ;;  %v4857_v39 = vld [vmem:[#allocation5 + $0x630] ss:$36 sps:$4 sm:$0xff]  }
  0x99   : > { %4249 = vmatprep.subr.bf16.mxu1 %v5295_v30  ;;  %751 = vmatpush1.bf16.msra.mxu0 %v4790_v49  ;;  %v4862_v49 = vld [vmem:[#allocation5 + $0x448] ss:$36 sps:$4 sm:$0xff]  }
  0x9a   : > { %752 = vmatprep.subr.bf16.mxu0 %v4791_v50  ;;  %v4860_v50 = vld [vmem:[#allocation5 + $0x444] ss:$36 sps:$4 sm:$0xff]  }
  0x9c   : > { %4250 = vmatpush3.bf16.msra.mxu1 %v4754_v42  ;;  %v4844_v42 = vld [vmem:[#allocation5 + $0x370] ss:$36 sps:$4 sm:$0xff]  }
  0x9d   : > { %4251 = vmatprep.subr.bf16.mxu1 %v5295_v30  ;;  %753 = vmatpush1.bf16.msra.mxu0 %v4796_v54  ;;  %v4869_v54 = vld [vmem:[#allocation5 + $0x4d4] ss:$36 sps:$4 sm:$0xff]  }
  0x9e   : > { %754 = vmatprep.subr.bf16.mxu0 %v4797_v56  ;;  %v4874_v56 = vld [vmem:[#allocation5 + $0x520] ss:$36 sps:$4 sm:$0xff]  }
  0xa0   : > { %4252 = vmatpush3.bf16.msra.mxu1 %v4758_v45  ;;  %v4850_v45 = vld [vmem:[#allocation5 + $0x3b8] ss:$36 sps:$4 sm:$0xff]  }
  0xa1   : > { %4253 = vmatprep.subr.bf16.mxu1 %v5295_v30  ;;  %755 = vmatpush1.bf16.msra.mxu0 %v4802_v59  ;;  %v4875_v59 = vld [vmem:[#allocation5 + $0x564] ss:$36 sps:$4 sm:$0xff]  }
  0xa2   : > { %756 = vmatprep.subr.bf16.mxu0 %v4803_v60  ;;  %v4880_v60 = vld [vmem:[#allocation5 + $0x5b0] ss:$36 sps:$4 sm:$0xff]  }
  0xa4   : > { %4254 = vmatpush3.bf16.msra.mxu1 %v4762_v48  ;;  %v4854_v48 = vld [vmem:[#allocation5 + $0x3fc] ss:$36 sps:$4 sm:$0xff]  }
  0xa5   : > { %4255 = vmatprep.subr.bf16.mxu1 %v5295_v30  ;;  %757 = vmatpush1.bf16.msra.mxu0 %v4808_v63  ;;  %v4881_v63 = vld [vmem:[#allocation5 + $0x5f4] ss:$36 sps:$4 sm:$0xff]  }
  0xa6   : > { %758 = vmatprep.subr.bf16.mxu0 %v4809_v0  ;;  %v4886_v0 = vld [vmem:[#allocation5 + $0x640] ss:$36 sps:$4 sm:$0xff]  }
  0xa8   : > { %4256 = vmatpush3.bf16.msra.mxu1 %v4766_v51  ;;  %v4868_v51 = vld [vmem:[#allocation5 + $0x490] ss:$36 sps:$4 sm:$0xff]  }
  0xa9   : > { %1372 = vmatprep.subr.bf16.mxu1 %v4771_v53  ;;  %759 = vmatpush1.bf16.msra.mxu0 %v4814_v3  ;;  %v4871_v53 = vld [vmem:[#allocation5 + $0x4d8] ss:$36 sps:$4 sm:$0xff]   ;;  %v4887_v3 = vld [vmem:[#allocation5 + $0x684] ss:$36 sps:$4 sm:$0xff]  }
  0xaa   : > { %760 = vmatprep.subr.bf16.mxu0 %v4815_v4  ;;  %v4890_v4 = vld [vmem:[#allocation5 + $0x260] ss:$36 sps:$4 sm:$0xff]  }
  0xab   : > { %4258 = vmatmul.mubr.bf16.vlgmr.msra.gmra.mrb[4].mxu1 %v5532_v55 }
  0xac   : > { %1373 = vmatpush1.bf16.msra.mxu1 %v4769_v57  ;;  %1404 = vmatprep.mubr.bf16.mxu1 %v5513_v13  ;;  %v4872_v57 = vld [vmem:[#allocation5 + $0x51c] ss:$36 sps:$4 sm:$0xff]  }
  0xad   : > { %1374 = vmatprep.subr.bf16.mxu1 %v4777_v58  ;;  %761 = vmatpush1.bf16.msra.mxu0 %v4820_v7  ;;  %v4877_v58 = vld [vmem:[#allocation5 + $0x568] ss:$36 sps:$4 sm:$0xff]  }
  0xae   : > { %771 = vmatprep.subr.bf16.mxu0 %v4823_v8  ;;  %v4893_v7 = vld [vmem:[#allocation5 + $0x68] ss:$36 sps:$4 sm:$0xff]   ;;  %v4894_v8 = vld [vmem:[#allocation5 + $0x2f0] ss:$36 sps:$4 sm:$0xff]  }
  0xb0   : > { %1375 = vmatpush1.bf16.msra.mxu1 %v4775_v61  ;;  %763 = vmatmul.mubr.bf16.vlgmr.msra.gmra.mrb[0].mxu0 %v5518_v27  ;;  %v4878_v61 = vld [vmem:[#allocation5 + $0x5ac] ss:$36 sps:$4 sm:$0xff]  }
  0xb1   : > { %1376 = vmatprep.subr.bf16.mxu1 %v4783_v62  ;;  %772 = vmatpush1.bf16.msra.mxu0 %v4821_v11  ;;  %v4883_v62 = vld [vmem:[#allocation5 + $0x5f8] ss:$36 sps:$4 sm:$0xff]  }
  0xb2   : > { %803 = vmatprep.mubr.bf16.mxu0 %v5297_v17  ;;  %773 = vmatprep.subr.bf16.mxu0 %v4829_v12  ;;  %v4897_v11 = vld [vmem:[#allocation5 + $0xf8] ss:$36 sps:$4 sm:$0xff]   ;;  %v4898_v12 = vld [vmem:[#allocation5 + $0x380] ss:$36 sps:$4 sm:$0xff]  }
  0xb4   : > { %1377 = vmatpush1.bf16.msra.mxu1 %v4781_v1  ;;  %v4884_v1 = vld [vmem:[#allocation5 + $0x63c] ss:$36 sps:$4 sm:$0xff]  }
  0xb5   : > { %1378 = vmatprep.subr.bf16.mxu1 %v4789_v2  ;;  %774 = vmatpush1.bf16.msra.mxu0 %v4827_v16  ;;  %v4889_v2 = vld [vmem:[#allocation5 + $0x688] ss:$36 sps:$4 sm:$0xff]  }
  0xb6   : > { %775 = vmatprep.subr.bf16.mxu0 %v4835_v18  ;;  %v4901_v16 = vld [vmem:[#allocation5 + $0x188] ss:$36 sps:$4 sm:$0xff]   ;;  %v4902_v18 = vld [vmem:[#allocation5 + $0x410] ss:$36 sps:$4 sm:$0xff]  }
  0xb8   : > { %1379 = vmatpush1.bf16.msra.mxu1 %v4787_v5  ;;  %v4891_v5 = vld [vmem:[#allocation5 + $0x20] ss:$36 sps:$4 sm:$0xff]  }
  0xb9   : > { %1380 = vmatprep.subr.bf16.mxu1 %v4795_v6  ;;  %776 = vmatpush1.bf16.msra.mxu0 %v4833_v21  ;;  %v4892_v6 = vld [vmem:[#allocation5 + $0x2a8] ss:$36 sps:$4 sm:$0xff]   ;;  %v4905_v21 = vld [vmem:[#allocation5 + $0x218] ss:$36 sps:$4 sm:$0xff]  }
  0xba   : > { %777 = vmatprep.subr.bf16.mxu0 %v4841_v22  ;;  %v4906_v22 = vld [vmem:[#allocation5 + $0x4a0] ss:$36 sps:$4 sm:$0xff]  }
  0xbc   : > { %1381 = vmatpush1.bf16.msra.mxu1 %v4793_v9  ;;  %v4895_v9 = vld [vmem:[#allocation5 + $0xb0] ss:$36 sps:$4 sm:$0xff]  }
  0xbd   : > { %1382 = vmatprep.subr.bf16.mxu1 %v4801_v10  ;;  %778 = vmatpush1.bf16.msra.mxu0 %v4839_v25  ;;  %v4896_v10 = vld [vmem:[#allocation5 + $0x338] ss:$36 sps:$4 sm:$0xff]  }
  0xbe   : > { %779 = vmatprep.subr.bf16.mxu0 %v4847_v26  ;;  %v4909_v25 = vld [vmem:[#allocation5 + $0x578] ss:$36 sps:$4 sm:$0xff]   ;;  %v4910_v26 = vld [vmem:[#allocation5 + $0x5c0] ss:$36 sps:$4 sm:$0xff]  }
  0xc0   : > { %1383 = vmatpush1.bf16.msra.mxu1 %v4799_v14  ;;  %v4899_v14 = vld [vmem:[#allocation5 + $0x140] ss:$36 sps:$4 sm:$0xff]  }
  0xc1   : > { %1384 = vmatprep.subr.bf16.mxu1 %v4807_v15  ;;  %780 = vmatpush1.bf16.msra.mxu0 %v4845_v31  ;;  %v4900_v15 = vld [vmem:[#allocation5 + $0x3c8] ss:$36 sps:$4 sm:$0xff]   ;;  %v4913_v31 = vld [vmem:[#allocation5 + $0x698] ss:$36 sps:$4 sm:$0xff]  }
  0xc2   : > { %781 = vmatprep.subr.bf16.mxu0 %v4853_v32 }
  0xc4   : > { %1385 = vmatpush1.bf16.msra.mxu1 %v4805_v19  ;;  %v4903_v19 = vld [vmem:[#allocation5 + $0x1d0] ss:$36 sps:$4 sm:$0xff]  }
  0xc5   : > { %1386 = vmatprep.subr.bf16.mxu1 %v4813_v20  ;;  %782 = vmatpush1.bf16.msra.mxu0 %v4851_v35  ;;  %v4904_v20 = vld [vmem:[#allocation5 + $0x458] ss:$36 sps:$4 sm:$0xff]  }
  0xc6   : > { %783 = vmatprep.subr.bf16.mxu0 %v4859_v36 }
  0xc8   : > { %1387 = vmatpush1.bf16.msra.mxu1 %v4811_v23  ;;  %v4907_v23 = vld [vmem:[#allocation5 + $0x4e8] ss:$36 sps:$4 sm:$0xff]  }
  0xc9   : > { %1388 = vmatprep.subr.bf16.mxu1 %v4819_v24  ;;  %784 = vmatpush1.bf16.msra.mxu0 %v4857_v39  ;;  %v4908_v24 = vld [vmem:[#allocation5 + $0x530] ss:$36 sps:$4 sm:$0xff]  }
  0xca   : > { %785 = vmatprep.subr.bf16.mxu0 %v4865_v40 }
  0xcc   : > { %1389 = vmatpush1.bf16.msra.mxu1 %v4817_v28  ;;  %v4911_v28 = vld [vmem:[#allocation5 + $0x608] ss:$36 sps:$4 sm:$0xff]  }
  0xcd   : > { %1390 = vmatprep.subr.bf16.mxu1 %v4826_v29  ;;  %786 = vmatpush1.bf16.msra.mxu0 %v4863_v43  ;;  %v4912_v29 = vld [vmem:[#allocation5 + $0x650] ss:$36 sps:$4 sm:$0xff]  }
  0xd0   : > { %1391 = vmatpush1.bf16.msra.mxu1 %v4824_v33  ;;  %804 = vmatmul.mubr.bf16.vlgmr.msra.gmra.mrb[0].mxu0 %v5532_v55 }
  0xd1   : > { %1392 = vmatprep.subr.bf16.mxu1 %v4832_v34  ;;  %1486 = vmatprep.mubr.bf16.mxu0 %v5513_v13 }
  0xd4   : > { %1393 = vmatpush1.bf16.msra.mxu1 %v4830_v37 }
  0xd5   : > { %1394 = vmatprep.subr.bf16.mxu1 %v4838_v38 }
  0xd8   : > { %1395 = vmatpush1.bf16.msra.mxu1 %v4836_v41 }
  0xd9   : > { %1396 = vmatprep.subr.bf16.mxu1 %v4844_v42 }
  0xdc   : > { %1397 = vmatpush1.bf16.msra.mxu1 %v4842_v44 }
  0xdd   : > { %1398 = vmatprep.subr.bf16.mxu1 %v4850_v45 }
  0xe0   : > { %1399 = vmatpush1.bf16.msra.mxu1 %v4848_v46  ;;  %v4914_v46 = vld [vmem:[#allocation5 + $0x254] ss:$36 sps:$4 sm:$0xff]  }
  0xe1   : > { %1400 = vmatprep.subr.bf16.mxu1 %v4856_v47  ;;  %v4915_v47 = vld [vmem:[#allocation5 + $0x14] ss:$36 sps:$4 sm:$0xff]   ;;  %4103 = vmatprep.subr.bf16.mxu0 %v4914_v46  ;;  %v4965_v46 = vld [vmem:[#allocation5 + $0x2a0] ss:$36 sps:$4 sm:$0xff]  }
  0xe2   : > { %4104 = vmatpush3.bf16.msra.mxu0 %v4915_v47  ;;  %v4970_v47 = vld [vmem:[#allocation5 + $0x2ec] ss:$36 sps:$4 sm:$0xff]  }
  0xe4   : > { %1401 = vmatpush1.bf16.msra.mxu1 %v4854_v48  ;;  %v4916_v48 = vld [vmem:[#allocation5 + $0x29c] ss:$36 sps:$4 sm:$0xff]  }
  0xe5   : > { %1402 = vmatprep.subr.bf16.mxu1 %v4862_v49  ;;  %v4917_v49 = vld [vmem:[#allocation5 + $0x5c] ss:$36 sps:$4 sm:$0xff]   ;;  %4105 = vmatprep.subr.bf16.mxu0 %v4916_v48  ;;  %v4968_v48 = vld [vmem:[#allocation5 + $0x2e8] ss:$36 sps:$4 sm:$0xff]  }
  0xe6   : > { %4106 = vmatpush3.bf16.msra.mxu0 %v4917_v49  ;;  %v4973_v49 = vld [vmem:[#allocation5 + $0x334] ss:$36 sps:$4 sm:$0xff]  }
  0xe8   : > { %1403 = vmatpush1.bf16.msra.mxu1 %v4860_v50  ;;  %v4918_v50 = vld [vmem:[#allocation5 + $0x2e4] ss:$36 sps:$4 sm:$0xff]  }
  0xe9   : > { %1413 = vmatprep.subr.bf16.mxu1 %v4868_v51  ;;  %4107 = vmatprep.subr.bf16.mxu0 %v4918_v50  ;;  %v4919_v51 = vld [vmem:[#allocation5 + $0xa4] ss:$36 sps:$4 sm:$0xff]   ;;  %v4971_v50 = vld [vmem:[#allocation5 + $0x330] ss:$36 sps:$4 sm:$0xff]  }
  0xea   : > { %4108 = vmatpush3.bf16.msra.mxu0 %v4919_v51  ;;  %v4976_v51 = vld [vmem:[#allocation5 + $0x37c] ss:$36 sps:$4 sm:$0xff]  }
  0xeb   : > { %1405 = vmatmul.mubr.bf16.vlgmr.msra.gmra.mrb[8].mxu1 %v5518_v27 }
  0xec   : > { %1414 = vmatpush1.bf16.msra.mxu1 %v4866_v52  ;;  %1445 = vmatprep.mubr.bf16.mxu1 %v5297_v17  ;;  %v4920_v52 = vld [vmem:[#allocation5 + $0x32c] ss:$36 sps:$4 sm:$0xff]  }
  0xed   : > { %1415 = vmatprep.subr.bf16.mxu1 %v4871_v53  ;;  %4109 = vmatprep.subr.bf16.mxu0 %v4920_v52  ;;  %v4974_v52 = vld [vmem:[#allocation5 + $0x378] ss:$36 sps:$4 sm:$0xff]  }
  0xf0   : > { %1416 = vmatpush1.bf16.msra.mxu1 %v4869_v54 }
  0xf1   : > { %1417 = vmatprep.subr.bf16.mxu1 %v4874_v56 }
  0xf4   : > { %1418 = vmatpush1.bf16.msra.mxu1 %v4872_v57 }
  0xf5   : > { %1419 = vmatprep.subr.bf16.mxu1 %v4877_v58  ;;  %v4921_v58 = vld [vmem:[#allocation5 + $0xec] ss:$36 sps:$4 sm:$0xff]  }
  0xf6   : > { %4110 = vmatpush3.bf16.msra.mxu0 %v4921_v58  ;;  %v4980_v58 = vld [vmem:[#allocation5 + $0x408] ss:$36 sps:$4 sm:$0xff]  }
  0xf8   : > { %1420 = vmatpush1.bf16.msra.mxu1 %v4875_v59 }
  0xf9   : > { %1421 = vmatprep.subr.bf16.mxu1 %v4880_v60  ;;  %v4922_v60 = vld [vmem:[#allocation5 + $0x374] ss:$36 sps:$4 sm:$0xff]  }
  0xfa   : > { %4111 = vmatprep.subr.bf16.mxu0 %v4922_v60  ;;  %v4983_v60 = vld [vmem:[#allocation5 + $0x450] ss:$36 sps:$4 sm:$0xff]  }
  0xfc   : > { %1422 = vmatpush1.bf16.msra.mxu1 %v4878_v61  ;;  %v4923_v61 = vld [vmem:[#allocation5 + $0x134] ss:$36 sps:$4 sm:$0xff]  }
  0xfd   : > { %1423 = vmatprep.subr.bf16.mxu1 %v4883_v62  ;;  %v4924_v62 = vld [vmem:[#allocation5 + $0x3bc] ss:$36 sps:$4 sm:$0xff]   ;;  %4112 = vmatpush3.bf16.msra.mxu0 %v4923_v61 }
  0xfe   : > { %4113 = vmatprep.subr.bf16.mxu0 %v4924_v62  ;;  %v4988_v61 = vld [vmem:[#allocation5 + $0x49c] ss:$36 sps:$4 sm:$0xff]  }
  0xff   : > { %v4986_v62 = vld [vmem:[#allocation5 + $0x498] ss:$36 sps:$4 sm:$0xff]  }
 0x100   : > { %1424 = vmatpush1.bf16.msra.mxu1 %v4881_v63  ;;  %v4925_v63 = vld [vmem:[#allocation5 + $0x17c] ss:$36 sps:$4 sm:$0xff]  }
 0x101   : > { %1425 = vmatprep.subr.bf16.mxu1 %v4886_v0  ;;  %v4926_v0 = vld [vmem:[#allocation5 + $0x404] ss:$36 sps:$4 sm:$0xff]   ;;  %4114 = vmatpush3.bf16.msra.mxu0 %v4925_v63 }
 0x102   : > { %4115 = vmatprep.subr.bf16.mxu0 %v4926_v0  ;;  %v4991_v63 = vld [vmem:[#allocation5 + $0x4e4] ss:$36 sps:$4 sm:$0xff]  }
 0x103   : > { %v4989_v0 = vld [vmem:[#allocation5 + $0x4e0] ss:$36 sps:$4 sm:$0xff]  }
 0x104   : > { %1426 = vmatpush1.bf16.msra.mxu1 %v4884_v1  ;;  %v4927_v1 = vld [vmem:[#allocation5 + $0x1c4] ss:$36 sps:$4 sm:$0xff]  }
 0x105   : > { %1427 = vmatprep.subr.bf16.mxu1 %v4889_v2  ;;  %v4928_v2 = vld [vmem:[#allocation5 + $0x44c] ss:$36 sps:$4 sm:$0xff]   ;;  %4116 = vmatpush3.bf16.msra.mxu0 %v4927_v1 }
 0x106   : > { %4117 = vmatprep.subr.bf16.mxu0 %v4928_v2  ;;  %v4994_v1 = vld [vmem:[#allocation5 + $0x52c] ss:$36 sps:$4 sm:$0xff]  }
 0x107   : > { %v4992_v2 = vld [vmem:[#allocation5 + $0x528] ss:$36 sps:$4 sm:$0xff]  }
 0x108   : > { %1428 = vmatpush1.bf16.msra.mxu1 %v4887_v3  ;;  %v4929_v3 = vld [vmem:[#allocation5 + $0x20c] ss:$36 sps:$4 sm:$0xff]  }
 0x109   : > { %4134 = vmatprep.subr.bf16.mxu1 %v4890_v4  ;;  %4118 = vmatpush3.bf16.msra.mxu0 %v4929_v3  ;;  %v4930_v4 = vld [vmem:[#allocation5 + $0x494] ss:$36 sps:$4 sm:$0xff]  }
 0x10a   : > { %4261 = vmatprep.subr.bf16.mxu0 %v5295_v30  ;;  %v4997_v3 = vld [vmem:[#allocation5 + $0x574] ss:$36 sps:$4 sm:$0xff]  }
 0x10b   : > { %1446 = vmatmul.mubr.bf16.vlgmr.msra.gmra.mrb[8].mxu1 %v5532_v55 }
 0x10c   : > { %4135 = vmatpush3.bf16.msra.mxu1 %v4891_v5  ;;  %2128 = vmatprep.mubr.bf16.mxu1 %v5513_v13  ;;  %v4931_v5 = vld [vmem:[#allocation5 + $0x4dc] ss:$36 sps:$4 sm:$0xff]  }
 0x10d   : > { %4136 = vmatprep.subr.bf16.mxu1 %v4892_v6  ;;  %1487 = vmatmul.mubr.bf16.vlgmr.msra.gmra.mrb[4].mxu0 %v5518_v27  ;;  %v4932_v6 = vld [vmem:[#allocation5 + $0x524] ss:$36 sps:$4 sm:$0xff]  }
 0x10e   : > { %4262 = vmatpush3.bf16.msra.mxu0 %v4930_v4  ;;  %4277 = vmatprep.mubr.msk.bf16.mxu0 %vm5296_vm0, %v5295_v30  ;;  %v4995_v4 = vld [vmem:[#allocation5 + $0x570] ss:$36 sps:$4 sm:$0xff]  }
 0x10f   : > { %4263 = vmatprep.subr.bf16.mxu0 %v5295_v30 }
 0x110   : > { %4137 = vmatpush3.bf16.msra.mxu1 %v4893_v7 }
 0x111   : > { %4138 = vmatprep.subr.bf16.mxu1 %v4894_v8 }
 0x112   : > { %4264 = vmatpush3.bf16.msra.mxu0 %v4931_v5  ;;  %v5000_v5 = vld [vmem:[#allocation5 + $0x5bc] ss:$36 sps:$4 sm:$0xff]  }
 0x113   : > { %4265 = vmatprep.subr.bf16.mxu0 %v5295_v30 }
 0x114   : > { %4139 = vmatpush3.bf16.msra.mxu1 %v4895_v9  ;;  %v4933_v9 = vld [vmem:[#allocation5 + $0x56c] ss:$36 sps:$4 sm:$0xff]  }
 0x115   : > { %4140 = vmatprep.subr.bf16.mxu1 %v4896_v10 }
 0x116   : > { %4266 = vmatpush3.bf16.msra.mxu0 %v4932_v6  ;;  %v4998_v6 = vld [vmem:[#allocation5 + $0x5b8] ss:$36 sps:$4 sm:$0xff]  }
 0x117   : > { %4267 = vmatprep.subr.bf16.mxu0 %v5295_v30 }
 0x118   : > { %4141 = vmatpush3.bf16.msra.mxu1 %v4897_v11 }
 0x119   : > { %4142 = vmatprep.subr.bf16.mxu1 %v4898_v12 }
 0x11a   : > { %4268 = vmatpush3.bf16.msra.mxu0 %v4933_v9  ;;  %v5009_v9 = vld [vmem:[#allocation5 + $0x694] ss:$36 sps:$4 sm:$0xff]  }
 0x11b   : > { %4269 = vmatprep.subr.bf16.mxu0 %v5295_v30 }
 0x11c   : > { %4143 = vmatpush3.bf16.msra.mxu1 %v4899_v14  ;;  %v4934_v14 = vld [vmem:[#allocation5 + $0x5b4] ss:$36 sps:$4 sm:$0xff]  }
 0x11d   : > { %4144 = vmatprep.subr.bf16.mxu1 %v4900_v15  ;;  %v4935_v15 = vld [vmem:[#allocation5 + $0x5fc] ss:$36 sps:$4 sm:$0xff]  }
 0x11e   : > { %4270 = vmatpush3.bf16.msra.mxu0 %v4934_v14 }
 0x11f   : > { %4271 = vmatprep.subr.bf16.mxu0 %v5295_v30 }
 0x120   : > { %4145 = vmatpush3.bf16.msra.mxu1 %v4901_v16  ;;  %v4936_v16 = vld [vmem:[#allocation5 + $0x644] ss:$36 sps:$4 sm:$0xff]  }
 0x121   : > { %4146 = vmatprep.subr.bf16.mxu1 %v4902_v18  ;;  %v4937_v18 = vld [vmem:[#allocation5 + $0x68c] ss:$36 sps:$4 sm:$0xff]  }
 0x122   : > { %4272 = vmatpush3.bf16.msra.mxu0 %v4935_v15  ;;  %v5299_v15 = vmov -1e+30  }
 0x123   : > { %4273 = vmatprep.subr.bf16.mxu0 %v5295_v30 }
 0x124   : > { %4147 = vmatpush3.bf16.msra.mxu1 %v4903_v19  ;;  %v4940_v19 = vld [vmem:[#allocation5 + $0x1c] ss:$36 sps:$4 sm:$0xff]  }
 0x125   : > { %4148 = vmatprep.subr.bf16.mxu1 %v4904_v20  ;;  %v4938_v20 = vld [vmem:[#allocation5 + $0x18] ss:$36 sps:$4 sm:$0xff]  }
 0x126   : > { %4274 = vmatpush3.bf16.msra.mxu0 %v4936_v16 }
 0x127   : > { %4275 = vmatprep.subr.bf16.mxu0 %v5295_v30 }
 0x128   : > { %4149 = vmatpush3.bf16.msra.mxu1 %v4905_v21  ;;  %v4943_v21 = vld [vmem:[#allocation5 + $0x64] ss:$36 sps:$4 sm:$0xff]  }
 0x129   : > { %4281 = vmatprep.subr.bf16.mxu1 %v5295_v30 }
 0x12a   : > { %4276 = vmatpush3.bf16.msra.mxu0 %v4937_v18 }
 0x12b   : > { %2129 = vmatmul.mubr.bf16.vlgmr.msra.gmra.mrb[12].mxu1 %v5518_v27  ;;  %2014 = vmatprep.subr.bf16.mxu0 %v4940_v19 }
 0x12c   : > { %4282 = vmatpush3.bf16.msra.mxu1 %v4906_v22  ;;  %4297 = vmatprep.mubr.msk.bf16.mxu1 %vm5296_vm0, %v5295_v30  ;;  %v4941_v22 = vld [vmem:[#allocation5 + $0x60] ss:$36 sps:$4 sm:$0xff]  }
 0x12d   : > { %4283 = vmatprep.subr.bf16.mxu1 %v5295_v30  ;;  %4278 = vmatmul.mubr.bf16.vlgmr.msra.gmra.mrb[8].mxu0 %v5532_v55 }
 0x12e   : > { %2015 = vmatpush1.bf16.msra.mxu0 %v4938_v20  ;;  %2046 = vmatprep.mubr.bf16.mxu0 %v5513_v13  ;;  %v4955_v13 = vld [vmem:[#allocation5 + $0x184] ss:$36 sps:$4 sm:$0xff]  }
 0x12f   : > { %2016 = vmatprep.subr.bf16.mxu0 %v4943_v21 }
 0x130   : > { %4284 = vmatpush3.bf16.msra.mxu1 %v4907_v23  ;;  %v4946_v23 = vld [vmem:[#allocation5 + $0xac] ss:$36 sps:$4 sm:$0xff]  }
 0x131   : > { %4285 = vmatprep.subr.bf16.mxu1 %v5295_v30 }
 0x132   : > { %2017 = vmatpush1.bf16.msra.mxu0 %v4941_v22 }
 0x133   : > { %2018 = vmatprep.subr.bf16.mxu0 %v4946_v23 }
 0x134   : > { %4286 = vmatpush3.bf16.msra.mxu1 %v4908_v24  ;;  %v4944_v24 = vld [vmem:[#allocation5 + $0xa8] ss:$36 sps:$4 sm:$0xff]  }
 0x135   : > { %4287 = vmatprep.subr.bf16.mxu1 %v5295_v30 }
 0x136   : > { %2019 = vmatpush1.bf16.msra.mxu0 %v4944_v24 }
 0x138   : > { %4288 = vmatpush3.bf16.msra.mxu1 %v4909_v25  ;;  %v4949_v25 = vld [vmem:[#allocation5 + $0xf4] ss:$36 sps:$4 sm:$0xff]  }
 0x139   : > { %4289 = vmatprep.subr.bf16.mxu1 %v5295_v30  ;;  %2020 = vmatprep.subr.bf16.mxu0 %v4949_v25 }
 0x13c   : > { %4290 = vmatpush3.bf16.msra.mxu1 %v4910_v26 }
 0x13d   : > { %4291 = vmatprep.subr.bf16.mxu1 %v5295_v30 }
 0x140   : > { %4292 = vmatpush3.bf16.msra.mxu1 %v4911_v28 }
 0x141   : > { %4293 = vmatprep.subr.bf16.mxu1 %v5295_v30 }
 0x144   : > { %4294 = vmatpush3.bf16.msra.mxu1 %v4912_v29 }
 0x145   : > { %4295 = vmatprep.subr.bf16.mxu1 %v5295_v30 }
 0x148   : > { %4296 = vmatpush3.bf16.msra.mxu1 %v4913_v31  ;;  %v4947_v31 = vld [vmem:[#allocation5 + $0xf0] ss:$36 sps:$4 sm:$0xff]  }
 0x149   : > { %4301 = vmatprep.subr.mxu1 %v5295_v30  ;;  %2021 = vmatpush1.bf16.msra.mxu0 %v4947_v31 }
 0x14b   : > { %4298 = vmatmul.mubr.bf16.vlgmr.msra.gmra.mrb[16].mxu1 %v5532_v55 }
 0x14c   : > { %4303 = vmatprep.mubr.msk.f32.mxu1 %vm5296_vm0, %v5295_v30 }
 0x15e   : > { %v4088_v32 = vpop.f32.mrb[0].mxu1 }
 0x15f   : > { %v4089_v33 = vpop.f32.mrb[1].mxu1 }
 0x160   : > { %v4090_v34 = vadd.f32 %v4089_v33, %v4088_v32  ;;  %v4091_v35 = vpop.f32.mrb[2].mxu1  ;;  %v4952_v33 = vld [vmem:[#allocation5 + $0x13c] ss:$36 sps:$4 sm:$0xff]  }
 0x161   : > { %v4092_v36 = vpop.f32.mrb[3].mxu1  ;;  %v4950_v35 = vld [vmem:[#allocation5 + $0x138] ss:$36 sps:$4 sm:$0xff]   ;;  %2022 = vmatprep.subr.bf16.mxu0 %v4952_v33 }
 0x162   : > { %2023 = vmatpush1.bf16.msra.mxu0 %v4950_v35  ;;  %v4953_v36 = vld [vmem:[#allocation5 + $0x180] ss:$36 sps:$4 sm:$0xff]  }
 0x163   : > { %2024 = vmatprep.subr.bf16.mxu0 %v4955_v13 }
 0x166   : > { %2025 = vmatpush1.bf16.msra.mxu0 %v4953_v36 }
 0x17e   : > { %v886_v37 = vpop.f32.mrb[4].mxu1 }
 0x17f   : > { %v5559_v38 = vadd.f32 %v4090_v34, %v886_v37  ;;  %v4259_v39 = vpop.f32.mrb[5].mxu1  ;;  %v4958_v37 = vld [vmem:[#allocation5 + $0x1cc] ss:$36 sps:$4 sm:$0xff]  }
 0x180   : > { %v889_v40 = vpop.f32.mrb[6].mxu1  ;;  %v4956_v39 = vld [vmem:[#allocation5 + $0x1c8] ss:$36 sps:$4 sm:$0xff]   ;;  %2026 = vmatprep.subr.bf16.mxu0 %v4958_v37 }
 0x181   : > { %v4260_v41 = vpop.f32.mrb[7].mxu1  ;;  %2027 = vmatpush1.bf16.msra.mxu0 %v4956_v39  ;;  %v4961_v40 = vld [vmem:[#allocation5 + $0x214] ss:$36 sps:$4 sm:$0xff]  }
 0x182   : > { %v4959_v41 = vld [vmem:[#allocation5 + $0x210] ss:$36 sps:$4 sm:$0xff]   ;;  %2028 = vmatprep.subr.bf16.mxu0 %v4961_v40 }
 0x185   : > { %2029 = vmatpush1.bf16.msra.mxu0 %v4959_v41 }
 0x1a3   : > { %v805_v42 = vpop.f32.mrb[0].mxu0 }
 0x1a4   : > { %v5561_v43 = vpop.f32.mrb[1].mxu0  ;;  %v2176_v56 = vmul.f32 0.125, %v805_v42  ;;  %v4964_v42 = vld [vmem:[#allocation5 + $0x25c] ss:$36 sps:$4 sm:$0xff]  }
 0x1a5   : > { %v809_v44 = vpop.f32.mrb[2].mxu0  ;;  %2030 = vmatprep.subr.bf16.mxu0 %v4964_v42 }
 0x1a6   : > { %v810_v45 = vpop.f32.mrb[3].mxu0  ;;  %v4962_v44 = vld [vmem:[#allocation5 + $0x258] ss:$36 sps:$4 sm:$0xff]  }
 0x1a7   : > { %2031 = vmatpush1.bf16.msra.mxu0 %v4962_v44  ;;  %v4967_v45 = vld [vmem:[#allocation5 + $0x2a4] ss:$36 sps:$4 sm:$0xff]  }
 0x1a8   : > { %2032 = vmatprep.subr.bf16.mxu0 %v4967_v45 }
 0x1ab   : > { %2033 = vmatpush1.bf16.msra.mxu0 %v4965_v46 }
 0x1ac   : > { %2034 = vmatprep.subr.bf16.mxu0 %v4970_v47 }
 0x1af   : > { %2035 = vmatpush1.bf16.msra.mxu0 %v4968_v48 }
 0x1b0   : > { %2036 = vmatprep.subr.bf16.mxu0 %v4973_v49 }
 0x1b3   : > { %2037 = vmatpush1.bf16.msra.mxu0 %v4971_v50 }
 0x1b4   : > { %2038 = vmatprep.subr.bf16.mxu0 %v4976_v51 }
 0x1b7   : > { %2039 = vmatpush1.bf16.msra.mxu0 %v4974_v52 }
 0x1de   : > { %v1447_v53 = vpop.f32.mrb[8].mxu1 }
 0x1df   : > { %2349 = vrot.lane.b32.xlu1 %v1447_v53, %s5298_s21  ;;  %v5564_v54 = vpop.f32.mrb[9].mxu1  ;;  %4302 = vmatpush3.xpose.msk.msra.mxu1 %vm2185_vm1, %v1447_v53  ;;  %v4979_v53 = vld [vmem:[#allocation5 + $0x3c4] ss:$36 sps:$4 sm:$0xff]  }
 0x1e0   : > { %v1451_v57 = vpop.f32.mrb[10].mxu1  ;;  %4306 = vmatprep.subr.mxu1 %v5295_v30  ;;  %2040 = vmatprep.subr.bf16.mxu0 %v4979_v53  ;;  %v4119_v22 = vpop.f32.mrb[4].mxu0 }
 0x1e1   : > { %v1452_v59 = vpop.f32.mrb[11].mxu1  ;;  %v4982_v57 = vld [vmem:[#allocation5 + $0x40c] ss:$36 sps:$4 sm:$0xff]   ;;  %v4120_v23 = vpop.f32.mrb[5].mxu0 }
 0x1e2   : > { %4304 = vmatmul.mubr.msk.f32.vlgmr.msra.gmra.mrb[20].mxu1 %vm2185_vm1, %v2176_v56  ;;  %v4985_v59 = vld [vmem:[#allocation5 + $0x454] ss:$36 sps:$4 sm:$0xff]   ;;  %v4122_v24 = vpop.f32.mrb[6].mxu0 }
 0x1e3   : > { %2347 = vrot.lane.b32.xlu1 %v2176_v56, %s5298_s21  ;;  %4308 = vmatprep.mubr.msk.f32.mxu1 %vm5296_vm0, %v5295_v30  ;;  %v4977_v56 = vld [vmem:[#allocation5 + $0x3c0] ss:$36 sps:$4 sm:$0xff]   ;;  %v4123_v25 = vpop.f32.mrb[7].mxu0 }
 0x1e4   : > { %2041 = vmatpush1.bf16.msra.mxu0 %v4977_v56 }
 0x1e5   : > { %2042 = vmatprep.subr.bf16.mxu0 %v4982_v57 }
 0x1e8   : > { %2043 = vmatpush1.bf16.msra.mxu0 %v4980_v58 }
 0x1e9   : > { %2044 = vmatprep.subr.bf16.mxu0 %v4985_v59 }
 0x1ec   : > { %2045 = vmatpush1.bf16.msra.mxu0 %v4983_v60 }
 0x1ed   : > { %2055 = vmatprep.subr.bf16.mxu0 %v4988_v61 }
 0x1ef   : > { %2047 = vmatmul.mubr.bf16.vlgmr.msra.gmra.mrb[12].mxu0 %v5518_v27  ;;  %v5001_v27 = vld [vmem:[#allocation5 + $0x600] ss:$36 sps:$4 sm:$0xff]  }
 0x1f0   : > { %2056 = vmatpush1.bf16.msra.mxu0 %v4986_v62  ;;  %2087 = vmatprep.mubr.bf16.mxu0 %v5297_v17  ;;  %v5004_v17 = vld [vmem:[#allocation5 + $0x648] ss:$36 sps:$4 sm:$0xff]  }
 0x1f1   : > { %2057 = vmatprep.subr.bf16.mxu0 %v4991_v63 }
 0x1f4   : > { %2058 = vmatpush1.bf16.msra.mxu0 %v4989_v0 }
 0x1f5   : > { %2059 = vmatprep.subr.bf16.mxu0 %v4994_v1 }
 0x1f8   : > { %2060 = vmatpush1.bf16.msra.mxu0 %v4992_v2  ;;  %v2177_v2 = vmul.f32 0.125, %v5561_v43 }
 0x1f9   : > { %2061 = vmatprep.subr.bf16.mxu0 %v4997_v3 }
 0x1fc   : > { %2062 = vmatpush1.bf16.msra.mxu0 %v4995_v4 }
 0x1fd   : > { %2063 = vmatprep.subr.bf16.mxu0 %v5000_v5 }
 0x1fe   : > { %v4150_v7 = vpop.f32.mrb[12].mxu1 }
 0x1ff   : > { %v4151_v8 = vpop.f32.mrb[13].mxu1 }
 0x200   : > { %v4152_v10 = vadd.f32 %v4151_v8, %v4150_v7  ;;  %v4153_v11 = vpop.f32.mrb[14].mxu1  ;;  %v5003_v7 = vld [vmem:[#allocation5 + $0x604] ss:$36 sps:$4 sm:$0xff]   ;;  %2064 = vmatpush1.bf16.msra.mxu0 %v4998_v6  ;;  %v5006_v8 = vld [vmem:[#allocation5 + $0x64c] ss:$36 sps:$4 sm:$0xff]  }
 0x201   : > { %v4154_v12 = vpop.f32.mrb[15].mxu1  ;;  %2065 = vmatprep.subr.bf16.mxu0 %v5003_v7  ;;  %v2179_v11 = vlaneseq }
 0x203   : > { %v5590_v12 = vshrl.u32 %v2179_v11, 7  ;;  %v2182_v14 = vand.u32 127, %v2179_v11 }
 0x204   : > { %2066 = vmatpush1.bf16.msra.mxu0 %v5001_v27 }
 0x205   : > { %2067 = vmatprep.subr.bf16.mxu0 %v5006_v8  ;;  %vm2183_vm2 = vcmp.le.s32.totalorder %v2182_v14, %v5590_v12 }
 0x206   : > { %v5593_v16 = vsel %vm2183_vm2, 0.0, %v5299_v15 }
 0x208   : > { %2068 = vmatpush1.bf16.msra.mxu0 %v5004_v17 }
 0x209   : > { %2069 = vmatprep.subr.bf16.mxu0 %v5009_v9 }
 0x21e   : > { %v2170_v26 = vpop.f32.mrb[16].mxu1 }
 0x21f   : > { %v5585_v28 = vadd.f32 %v4152_v10, %v2170_v26  ;;  %v4299_v29 = vpop.f32.mrb[17].mxu1  ;;  %v5007_v10 = vld [vmem:[#allocation5 + $0x690] ss:$36 sps:$4 sm:$0xff]   ;;  %v1528_v26 = vpop.f32.mrb[8].mxu0 }
 0x220   : > { %v2173_v32 = vpop.f32.mrb[18].mxu1  ;;  %2070 = vmatpush1.bf16.msra.mxu0 %v5007_v10  ;;  %v4279_v31 = vpop.f32.mrb[9].mxu0 }
 0x221   : > { %v4300_v34 = vpop.f32.mrb[19].mxu1  ;;  %v1531_v32 = vpop.f32.mrb[10].mxu0 }
 0x222   : > { %v4280_v33 = vpop.f32.mrb[11].mxu0 }
 0x223   : > { %2088 = vmatmul.mubr.bf16.vlgmr.msra.gmra.mrb[12].mxu0 %v5532_v55  ;;  %v4121_v55 = vadd.f32 %v4120_v23, %v4119_v22 }
 0x225   : > { %v5597_v29 = vadd.f32 %v4121_v55, %v1528_v26 }
 0x251   : > { %v2350_v46 = vpop.permute.xlu1 %2349 }
 0x255   : > { %v2348_v48 = vpop.permute.xlu1 %2347 }
 0x2b5   : > { %v2258_v18 = vpop.f32.mrb[20].mxu1 }
 0x2b6   : > { %v2259_v19 = vadd.f32 %v2258_v18, %v5593_v16  ;;  %v4305_v20 = vpop.f32.mrb[21].mxu1 }
 0x2b8   : > { %v2263_v21 = vsel %vm2262_vm3, %v2259_v19, -inf }
 0x2b9   : > { %2264 = vmax.xlane.f32.xlu0 %v2263_v21 }
 0x2f6   : > { %v2089_v36 = vpop.f32.mrb[12].mxu0 }
 0x2f7   : > { %v5599_v37 = vpop.f32.mrb[13].mxu0  ;;  %4307 = vmatpush3.msra.mxu1 %v2089_v36 }
 0x2f8   : > { %v2093_v39 = vpop.f32.mrb[14].mxu0  ;;  %4311 = vmatprep.subr.mxu1 %v5295_v30 }
 0x2f9   : > { %v2094_v40 = vpop.f32.mrb[15].mxu0 }
 0x346   : > { %v2265_v34 = vpop.xlane.xlu0 %2264 }
 0x347   : > { %v2266_v35 = vsub.f32 %v2259_v19, %v2265_v34 }
 0x349   : > { %v2267_v13 = vmul.f32 1.442695, %v2266_v35 }
 0x34b   : > { %5106 = vpow2.f32 %v2267_v13 }
 0x355   : > { %v5107_v41 = vpop.eup %5106 }
 0x356   : > { %v2269_v42 = vsel %vm2262_vm3, %v5107_v41, 0.0 }
 0x357   : > { %2270 = vadd.xlane.f32.xlu0 %v2269_v42 }
 0x3e4   : > { %v2271_v44 = vpop.xlane.xlu0 %2270 }
 0x3e5   : > { %5108 = vrcp.f32 %v2271_v44 }
 0x3ef   : > { %v5109_v45 = vpop.eup %5108 }
 0x3f0   : > { %v2273_v47 = vmul.f32 %v5109_v45, %v5107_v41 }
 0x3f2   : > { %4309 = vmatmul.mubr.msk.f32.vlgmr.msra.gmra.mrb[22].mxu1 %vm2262_vm3, %v2273_v47 }
 0x3f3   : > { %4312 = vmatpush3.xpose.msk.msra.mxu1 %vm2185_vm1, %v2350_v46  ;;  %4313 = vmatprep.mubr.msk.f32.mxu1 %vm5296_vm0, %v5295_v30 }
 0x3f4   : > { %4316 = vmatprep.subr.mxu1 %v5295_v30 }
 0x3f6   : > { %4314 = vmatmul.mubr.msk.f32.vlgmr.msra.gmra.mrb[24].mxu1 %vm2185_vm1, %v2348_v48 }
 0x3f7   : > { %4318 = vmatprep.mubr.msk.f32.mxu1 %vm5296_vm0, %v5295_v30 }
 0x4c5   : > { %v5611_v49 = vpop.f32.mrb[22].mxu1 }
 0x4c6   : > { %v4310_v50 = vpop.f32.mrb[23].mxu1 }
 0x4c9   : > { %v2421_v51 = vpop.f32.mrb[24].mxu1 }
 0x4ca   : > { %v2422_v52 = vadd.f32 %v2421_v51, %v5593_v16  ;;  %v4315_v53 = vpop.f32.mrb[25].mxu1 }
 0x4cc   : > { %v2425_v56 = vsel %vm2262_vm3, %v2422_v52, -inf }
 0x4cd   : > { %2426 = vmax.xlane.f32.xlu0 %v2425_v56 }
 0x4e3   : > { %2437 = vrot.lane.b32.xlu0 %v2089_v36, %s5298_s21  ;;  %v2178_v36 = vmul.f32 0.125, %v5559_v38 }
 0x55a   : > { %v2427_v57 = vpop.xlane.xlu0 %2426 }
 0x55b   : > { %v2428_v58 = vsub.f32 %v2422_v52, %v2427_v57 }
 0x55d   : > { %v2429_v59 = vmul.f32 1.442695, %v2428_v58 }
 0x55e   : > { %v2438_v60 = vpop.permute.xlu0 %2437 }
 0x55f   : > { %5110 = vpow2.f32 %v2429_v59  ;;  %4317 = vmatpush3.msra.mxu1 %v2438_v60 }
 0x560   : > { %4321 = vmatprep.subr.mxu1 %v5295_v30 }
 0x569   : > { %v5111_v61 = vpop.eup %5110 }
 0x56a   : > { %v2431_v62 = vsel %vm2262_vm3, %v5111_v61, 0.0 }
 0x56b   : > { %2432 = vadd.xlane.f32.xlu1 %v2431_v62 }
 0x5f8   : > { %v2433_v63 = vpop.xlane.xlu1 %2432 }
 0x5f9   : > { %5112 = vrcp.f32 %v2433_v63  ;;  %v5010_v63 = vld [vmem:[#allocation7 + $0x4] ss:$12 sps:$4 sm:$0xff]  }
 0x5fa   : > { %4397 = vmatprep.subr.bf16.mxu0 %v5010_v63  ;;  %v5073_v63 = vld [vmem:[#allocation7 + $0xb0] ss:$12 sps:$4 sm:$0xff]  }
 0x603   : > { %v5113_v0 = vpop.eup %5112 }
 0x604   : > { %v2435_v1 = vmul.f32 %v5113_v0, %v5111_v61  ;;  %v5012_v0 = vld [vmem:[#allocation7] ss:$12 sps:$4 sm:$0xff]  }
 0x605   : > { %4399 = vmatpush1.bf16.msra.mxu0 %v5012_v0  ;;  %v5074_v0 = vld [vmem:[#allocation7 + $0x184] ss:$12 sps:$4 sm:$0xff]  }
 0x606   : > { %4319 = vmatmul.mubr.msk.f32.vlgmr.msra.gmra.mrb[26].mxu1 %vm2262_vm3, %v2435_v1  ;;  %v5013_v1 = vld [vmem:[#allocation7 + $0x1c] ss:$12 sps:$4 sm:$0xff]  }
 0x607   : > { %4322 = vmatpush3.xpose.msk.msra.mxu1 %vm2185_vm1, %v5564_v54  ;;  %4323 = vmatprep.mubr.msk.f32.mxu1 %vm5296_vm0, %v5295_v30 }
 0x608   : > { %4326 = vmatprep.subr.mxu1 %v5295_v30  ;;  %4401 = vmatprep.subr.bf16.mxu0 %v5013_v1  ;;  %v5076_v1 = vld [vmem:[#allocation7 + $0x180] ss:$12 sps:$4 sm:$0xff]  }
 0x60a   : > { %4324 = vmatmul.mubr.msk.f32.vlgmr.msra.gmra.mrb[28].mxu1 %vm2185_vm1, %v2177_v2 }
 0x60b   : > { %4327 = vmatpush3.msra.mxu1 %v5599_v37  ;;  %4328 = vmatprep.mubr.msk.f32.mxu1 %vm5296_vm0, %v5295_v30 }
 0x60c   : > { %4331 = vmatprep.subr.mxu1 %v5295_v30 }
 0x6d9   : > { %v5630_v3 = vpop.f32.mrb[26].mxu1 }
 0x6da   : > { %v4320_v4 = vpop.f32.mrb[27].mxu1 }
 0x6db   : > { %v5016_v4 = vld [vmem:[#allocation7 + $0x34] ss:$12 sps:$4 sm:$0xff]  }
 0x6dd   : > { %v2585_v5 = vpop.f32.mrb[28].mxu1 }
 0x6de   : > { %v2586_v6 = vadd.f32 %v2585_v5, %v5593_v16  ;;  %v4325_v7 = vpop.f32.mrb[29].mxu1  ;;  %v5018_v5 = vld [vmem:[#allocation7 + $0x30] ss:$12 sps:$4 sm:$0xff]  }
 0x6df   : > { %v5021_v7 = vld [vmem:[#allocation7 + $0x48] ss:$12 sps:$4 sm:$0xff]  }
 0x6e0   : > { %v2589_v43 = vsel %vm2262_vm3, %v2586_v6, -inf }
 0x6e1   : > { %2590 = vmax.xlane.f32.xlu0 %v2589_v43  ;;  %v5024_v43 = vld [vmem:[#allocation7 + $0x60] ss:$12 sps:$4 sm:$0xff]  }
 0x6f7   : > { %2673 = vrot.lane.b32.xlu0 %v2177_v2, %s5298_s21  ;;  %v5015_v2 = vld [vmem:[#allocation7 + $0x18] ss:$12 sps:$4 sm:$0xff]  }
 0x6f8   : > { %4403 = vmatpush1.bf16.msra.mxu0 %v5015_v2  ;;  %v5300_v2 = vmov 0.0|0.0  }
 0x6f9   : > { %4405 = vmatprep.subr.bf16.mxu0 %v5016_v4  ;;  %v5077_v4 = vld [vmem:[#allocation7 + $0x188] ss:$12 sps:$4 sm:$0xff]  }
 0x6fc   : > { %4407 = vmatpush1.bf16.msra.mxu0 %v5018_v5  ;;  %v5078_v5 = vld [vmem:[#allocation7 + $0x19c] ss:$12 sps:$4 sm:$0xff]  }
 0x76e   : > { %v2591_v27 = vpop.xlane.xlu0 %2590 }
 0x76f   : > { %v2592_v8 = vsub.f32 %v2586_v6, %v2591_v27  ;;  %v5019_v6 = vld [vmem:[#allocation7 + $0x4c] ss:$12 sps:$4 sm:$0xff]   ;;  %v5025_v27 = vld [vmem:[#allocation7 + $0x7c] ss:$12 sps:$4 sm:$0xff]  }
 0x770   : > { %4409 = vmatprep.subr.bf16.mxu0 %v5019_v6  ;;  %v5080_v6 = vld [vmem:[#allocation7 + $0x198] ss:$12 sps:$4 sm:$0xff]  }
 0x771   : > { %v2593_v17 = vmul.f32 1.442695, %v2592_v8  ;;  %4411 = vmatpush1.bf16.msra.mxu0 %v5021_v7  ;;  %v5027_v8 = vld [vmem:[#allocation7 + $0x78] ss:$12 sps:$4 sm:$0xff]   ;;  %v5081_v7 = vld [vmem:[#allocation7 + $0x1a0] ss:$12 sps:$4 sm:$0xff]  }
 0x772   : > { %v2674_v19 = vpop.permute.xlu0 %2673 }
 0x773   : > { %5114 = vpow2.f32 %v2593_v17  ;;  %v5028_v17 = vld [vmem:[#allocation7 + $0x94] ss:$12 sps:$4 sm:$0xff]  }
 0x77d   : > { %v5115_v9 = vpop.eup %5114 }
 0x77e   : > { %v2595_v10 = vsel %vm2262_vm3, %v5115_v9, 0.0 }
 0x77f   : > { %2596 = vadd.xlane.f32.xlu1 %v2595_v10  ;;  %v5031_v10 = vld [vmem:[#allocation7 + $0xac] ss:$12 sps:$4 sm:$0xff]  }
 0x790   : > { %2675 = vrot.lane.b32.xlu1 %v5564_v54, %s5298_s21 }
 0x80c   : > { %v2597_v11 = vpop.xlane.xlu1 %2596 }
 0x80d   : > { %5116 = vrcp.f32 %v2597_v11  ;;  %v5033_v11 = vld [vmem:[#allocation7 + $0xa8] ss:$12 sps:$4 sm:$0xff]  }
 0x810   : > { %v2676_v18 = vpop.permute.xlu1 %2675 }
 0x817   : > { %v5117_v14 = vpop.eup %5116 }
 0x818   : > { %v2599_v15 = vmul.f32 %v5117_v14, %v5115_v9  ;;  %v5030_v9 = vld [vmem:[#allocation7 + $0x90] ss:$12 sps:$4 sm:$0xff]  }
 0x819   : > { %v5034_v14 = vld [vmem:[#allocation7 + $0xc4] ss:$12 sps:$4 sm:$0xff]  }
 0x81a   : > { %4329 = vmatmul.mubr.msk.f32.vlgmr.msra.gmra.mrb[30].mxu1 %vm2262_vm3, %v2599_v15  ;;  %v5036_v15 = vld [vmem:[#allocation7 + $0xc0] ss:$12 sps:$4 sm:$0xff]  }
 0x81b   : > { %4332 = vmatpush3.xpose.msk.msra.mxu1 %vm2185_vm1, %v2676_v18  ;;  %4333 = vmatprep.mubr.msk.f32.mxu1 %vm5296_vm0, %v5295_v30  ;;  %v5037_v18 = vld [vmem:[#allocation7 + $0xdc] ss:$12 sps:$4 sm:$0xff]  }
 0x81c   : > { %4336 = vmatprep.subr.mxu1 %v5295_v30 }
 0x81e   : > { %4334 = vmatmul.mubr.msk.f32.vlgmr.msra.gmra.mrb[32].mxu1 %vm2185_vm1, %v2674_v19  ;;  %v5039_v19 = vld [vmem:[#allocation7 + $0xd8] ss:$12 sps:$4 sm:$0xff]  }
 0x81f   : > { %4338 = vmatprep.mubr.msk.f32.mxu1 %vm5296_vm0, %v5295_v30 }
 0x8ed   : > { %v5646_v54 = vpop.f32.mrb[30].mxu1 }
 0x8ee   : > { %v4330_v20 = vpop.f32.mrb[31].mxu1 }
 0x8ef   : > { %v5040_v20 = vld [vmem:[#allocation7 + $0xf4] ss:$12 sps:$4 sm:$0xff]  }
 0x8f1   : > { %v2747_v21 = vpop.f32.mrb[32].mxu1 }
 0x8f2   : > { %v2748_v22 = vadd.f32 %v2747_v21, %v5593_v16  ;;  %v4335_v23 = vpop.f32.mrb[33].mxu1  ;;  %v5042_v21 = vld [vmem:[#allocation7 + $0xf0] ss:$12 sps:$4 sm:$0xff]  }
 0x8f3   : > { %v5045_v23 = vld [vmem:[#allocation7 + $0x108] ss:$12 sps:$4 sm:$0xff]  }
 0x8f4   : > { %v2751_v55 = vsel %vm2262_vm3, %v2748_v22, -inf }
 0x8f5   : > { %2752 = vmax.xlane.f32.xlu1 %v2751_v55  ;;  %v5046_v55 = vld [vmem:[#allocation7 + $0x124] ss:$12 sps:$4 sm:$0xff]  }
 0x906   : > { %2763 = vrot.lane.b32.xlu1 %v5599_v37, %s5298_s21 }
 0x982   : > { %v2753_v24 = vpop.xlane.xlu1 %2752 }
 0x983   : > { %v2754_v25 = vsub.f32 %v2748_v22, %v2753_v24  ;;  %v5043_v22 = vld [vmem:[#allocation7 + $0x10c] ss:$12 sps:$4 sm:$0xff]  }
 0x984   : > { %v5048_v24 = vld [vmem:[#allocation7 + $0x120] ss:$12 sps:$4 sm:$0xff]  }
 0x985   : > { %v2755_v26 = vmul.f32 1.442695, %v2754_v25 }
 0x986   : > { %v2764_v31 = vpop.permute.xlu1 %2763 }
 0x987   : > { %5118 = vpow2.f32 %v2755_v26  ;;  %4337 = vmatpush3.msra.mxu1 %v2764_v31 }
 0x988   : > { %4341 = vmatprep.subr.mxu1 %v5295_v30 }
 0x991   : > { %v5119_v32 = vpop.eup %5118 }
 0x992   : > { %v2757_v33 = vsel %vm2262_vm3, %v5119_v32, 0.0 }
 0x993   : > { %2758 = vadd.xlane.f32.xlu0 %v2757_v33 }
 0xa20   : > { %v2759_v34 = vpop.xlane.xlu0 %2758 }
 0xa21   : > { %5120 = vrcp.f32 %v2759_v34  ;;  %v5049_v34 = vld [vmem:[#allocation7 + $0x13c] ss:$12 sps:$4 sm:$0xff]  }
 0xa2b   : > { %v5121_v35 = vpop.eup %5120 }
 0xa2c   : > { %v2761_v13 = vmul.f32 %v5121_v35, %v5119_v32  ;;  %v5051_v35 = vld [vmem:[#allocation7 + $0x138] ss:$12 sps:$4 sm:$0xff]  }
 0xa2e   : > { %4339 = vmatmul.mubr.msk.f32.vlgmr.msra.gmra.mrb[34].mxu1 %vm2262_vm3, %v2761_v13  ;;  %v5052_v13 = vld [vmem:[#allocation7 + $0x154] ss:$12 sps:$4 sm:$0xff]  }
 0xa2f   : > { %4342 = vmatpush3.xpose.msk.msra.mxu1 %vm2185_vm1, %v5597_v29  ;;  %4343 = vmatprep.mubr.msk.f32.mxu1 %vm5296_vm0, %v5295_v30 }
 0xa30   : > { %4346 = vmatprep.subr.mxu1 %v5295_v30 }
 0xa32   : > { %4344 = vmatmul.mubr.msk.f32.vlgmr.msra.gmra.mrb[36].mxu1 %vm2185_vm1, %v2178_v36 }
 0xa33   : > { %4347 = vmatpush3.msra.mxu1 %v5585_v28  ;;  %4348 = vmatprep.mubr.msk.f32.mxu1 %vm5296_vm0, %v5295_v30 }
 0xa34   : > { %4351 = vmatprep.subr.mxu1 %v5295_v30 }
 0xb01   : > { %v5666_v37 = vpop.f32.mrb[34].mxu1 }
 0xb02   : > { %v4717_v39 = vpack.i.bf16 %v5630_v3, %v5666_v37  ;;  %v4340_v40 = vpop.f32.mrb[35].mxu1  ;;  %v5059_v37 = vld [vmem:[#allocation7 + $0x8] ss:$12 sps:$4 sm:$0xff]  }
 0xb03   : > { %v5055_v40 = vld [vmem:[#allocation7 + $0x16c] ss:$12 sps:$4 sm:$0xff]  }
 0xb05   : > { %v2911_v41 = vpop.f32.mrb[36].mxu1 }
 0xb06   : > { %v2912_v38 = vadd.f32 %v2911_v41, %v5593_v16  ;;  %v4345_v42 = vpop.f32.mrb[37].mxu1  ;;  %v5057_v41 = vld [vmem:[#allocation7 + $0x168] ss:$12 sps:$4 sm:$0xff]  }
 0xb07   : > { %v5058_v42 = vld [vmem:[#allocation7 + $0xc8] ss:$12 sps:$4 sm:$0xff]  }
 0xb08   : > { %v2915_v44 = vsel %vm2262_vm3, %v2912_v38, -inf }
 0xb09   : > { %2916 = vmax.xlane.f32.xlu0 %v2915_v44 }
 0xb1f   : > { %3001 = vrot.lane.b32.xlu0 %v5597_v29, %s5298_s21 }
 0xb23   : > { %2999 = vrot.lane.b32.xlu0 %v2178_v36, %s5298_s21  ;;  %v5054_v36 = vld [vmem:[#allocation7 + $0x150] ss:$12 sps:$4 sm:$0xff]  }
 0xb96   : > { %v2917_v45 = vpop.xlane.xlu0 %2916 }
 0xb97   : > { %v2918_v46 = vsub.f32 %v2912_v38, %v2917_v45 }
 0xb99   : > { %v2919_v47 = vmul.f32 1.442695, %v2918_v46 }
 0xb9a   : > { %v3002_v53 = vpop.permute.xlu0 %3001 }
 0xb9b   : > { %5122 = vpow2.f32 %v2919_v47 }
 0xb9e   : > { %v3000_v29 = vpop.permute.xlu0 %2999 }
 0xba5   : > { %v5123_v48 = vpop.eup %5122 }
 0xba6   : > { %v2921_v50 = vsel %vm2262_vm3, %v5123_v48, 0.0 }
 0xba7   : > { %2922 = vadd.xlane.f32.xlu1 %v2921_v50  ;;  %v5060_v50 = vld [vmem:[#allocation7 + $0xe0] ss:$12 sps:$4 sm:$0xff]  }
 0xc34   : > { %v2923_v51 = vpop.xlane.xlu1 %2922 }
 0xc35   : > { %5124 = vrcp.f32 %v2923_v51  ;;  %v5061_v51 = vld [vmem:[#allocation7 + $0x20] ss:$12 sps:$4 sm:$0xff]  }
 0xc3f   : > { %v5125_v52 = vpop.eup %5124 }
 0xc40   : > { %v2925_v56 = vmul.f32 %v5125_v52, %v5123_v48  ;;  %v5062_v52 = vld [vmem:[#allocation7 + $0xf8] ss:$12 sps:$4 sm:$0xff]  }
 0xc42   : > { %4349 = vmatmul.mubr.msk.f32.vlgmr.msra.gmra.mrb[38].mxu1 %vm2262_vm3, %v2925_v56  ;;  %v5066_v56 = vld [vmem:[#allocation7 + $0x128] ss:$12 sps:$4 sm:$0xff]  }
 0xc43   : > { %4352 = vmatpush3.xpose.msk.msra.mxu1 %vm2185_vm1, %v3002_v53  ;;  %4353 = vmatprep.mubr.msk.f32.mxu1 %vm5296_vm0, %v5295_v30  ;;  %v5063_v53 = vld [vmem:[#allocation7 + $0x38] ss:$12 sps:$4 sm:$0xff]  }
 0xc44   : > { %4356 = vmatprep.subr.mxu1 %v5295_v30 }
 0xc46   : > { %4354 = vmatmul.mubr.msk.f32.vlgmr.msra.gmra.mrb[40].mxu1 %vm2185_vm1, %v3000_v29  ;;  %v5067_v29 = vld [vmem:[#allocation7 + $0x68] ss:$12 sps:$4 sm:$0xff]  }
 0xc47   : > { %4358 = vmatprep.mubr.msk.f32.mxu1 %vm5296_vm0, %v5295_v30 }
 0xd15   : > { %v5684_v57 = vpop.f32.mrb[38].mxu1 }
 0xd16   : > { %v4350_v58 = vpop.f32.mrb[39].mxu1 }
 0xd17   : > { %v5068_v58 = vld [vmem:[#allocation7 + $0x140] ss:$12 sps:$4 sm:$0xff]  }
 0xd19   : > { %v3073_v59 = vpop.f32.mrb[40].mxu1 }
 0xd1a   : > { %v3074_v60 = vadd.f32 %v3073_v59, %v5593_v16  ;;  %v4355_v61 = vpop.f32.mrb[41].mxu1  ;;  %v5022_v16 = vld [vmem:[#allocation7 + $0x64] ss:$12 sps:$4 sm:$0xff]   ;;  %v5069_v59 = vld [vmem:[#allocation7 + $0x80] ss:$12 sps:$4 sm:$0xff]  }
 0xd1b   : > { %4413 = vmatprep.subr.bf16.mxu0 %v5022_v16  ;;  %v5071_v61 = vld [vmem:[#allocation7 + $0x98] ss:$12 sps:$4 sm:$0xff]   ;;  %v5082_v16 = vld [vmem:[#allocation7 + $0x1b4] ss:$12 sps:$4 sm:$0xff]  }
 0xd1c   : > { %v3077_v62 = vsel %vm2262_vm3, %v3074_v60, -inf  ;;  %4415 = vmatpush1.bf16.msra.mxu0 %v5024_v43  ;;  %v5084_v43 = vld [vmem:[#allocation7 + $0x1b0] ss:$12 sps:$4 sm:$0xff]  }
 0xd1d   : > { %3078 = vmax.xlane.f32.xlu0 %v3077_v62  ;;  %4417 = vmatprep.subr.bf16.mxu0 %v5025_v27  ;;  %v5072_v62 = vld [vmem:[#allocation7 + $0x170] ss:$12 sps:$4 sm:$0xff]   ;;  %v5085_v27 = vld [vmem:[#allocation7 + $0x1b8] ss:$12 sps:$4 sm:$0xff]  }
 0xd20   : > { %4419 = vmatpush1.bf16.msra.mxu0 %v5027_v8  ;;  %v5088_v8 = vld [vmem:[#allocation7 + $0x1c8] ss:$12 sps:$4 sm:$0xff]  }
 0xd21   : > { %4421 = vmatprep.subr.bf16.mxu0 %v5028_v17  ;;  %v5089_v17 = vld [vmem:[#allocation7 + $0x1d0] ss:$12 sps:$4 sm:$0xff]  }
 0xd24   : > { %4423 = vmatpush1.bf16.msra.mxu0 %v5030_v9  ;;  %v5090_v9 = vld [vmem:[#allocation7 + $0x1e4] ss:$12 sps:$4 sm:$0xff]  }
 0xd25   : > { %4425 = vmatprep.subr.bf16.mxu0 %v5031_v10  ;;  %v5092_v10 = vld [vmem:[#allocation7 + $0x1e0] ss:$12 sps:$4 sm:$0xff]  }
 0xd28   : > { %4427 = vmatpush1.bf16.msra.mxu0 %v5033_v11  ;;  %v5093_v11 = vld [vmem:[#allocation7 + $0x1e8] ss:$12 sps:$4 sm:$0xff]  }
 0xd29   : > { %4429 = vmatprep.subr.bf16.mxu0 %v5034_v14  ;;  %v5094_v14 = vld [vmem:[#allocation7 + $0x1fc] ss:$12 sps:$4 sm:$0xff]  }
 0xd2c   : > { %4431 = vmatpush1.bf16.msra.mxu0 %v5036_v15  ;;  %v5096_v15 = vld [vmem:[#allocation7 + $0x1f8] ss:$12 sps:$4 sm:$0xff]  }
 0xd2d   : > { %4433 = vmatprep.subr.bf16.mxu0 %v5037_v18  ;;  %v5097_v18 = vld [vmem:[#allocation7 + $0x200] ss:$12 sps:$4 sm:$0xff]  }
 0xd30   : > { %4435 = vmatpush1.bf16.msra.mxu0 %v5039_v19  ;;  %v5098_v19 = vld [vmem:[#allocation7 + $0x214] ss:$12 sps:$4 sm:$0xff]  }
 0xd31   : > { %4437 = vmatprep.subr.bf16.mxu0 %v5040_v20  ;;  %v5100_v20 = vld [vmem:[#allocation7 + $0x210] ss:$12 sps:$4 sm:$0xff]  }
 0xd34   : > { %4439 = vmatpush1.bf16.msra.mxu0 %v5042_v21  ;;  %v5101_v21 = vld [vmem:[#allocation7 + $0x218] ss:$12 sps:$4 sm:$0xff]  }
 0xd35   : > { %4441 = vmatprep.subr.bf16.mxu0 %v5043_v22  ;;  %v5102_v22 = vld [vmem:[#allocation7 + $0x22c] ss:$12 sps:$4 sm:$0xff]  }
 0xd38   : > { %4443 = vmatpush1.bf16.msra.mxu0 %v5045_v23  ;;  %v5104_v23 = vld [vmem:[#allocation7 + $0x228] ss:$12 sps:$4 sm:$0xff]  }
 0xd39   : > { %4445 = vmatprep.subr.bf16.mxu0 %v5046_v55  ;;  %v5105_v55 = vld [vmem:[#allocation7 + $0x230] ss:$12 sps:$4 sm:$0xff]  }
 0xd3c   : > { %4447 = vmatpush1.bf16.msra.mxu0 %v5048_v24 }
 0xd3d   : > { %4449 = vmatprep.subr.bf16.mxu0 %v5049_v34 }
 0xd40   : > { %4451 = vmatpush1.bf16.msra.mxu0 %v5051_v35  ;;  %v3432_v35 = vsub.s32 2, %v5590_v12 }
 0xd41   : > { %4453 = vmatprep.subr.bf16.mxu0 %v5052_v13  ;;  %v3420_v13 = vld [vmem:[%s5765_s3] sm:$0x7] }
 0xd44   : > { %4455 = vmatpush1.bf16.msra.mxu0 %v5054_v36  ;;  %v3424_v36 = vsub.s32 0, %v5590_v12 }
 0xd45   : > { %4457 = vmatprep.subr.bf16.mxu0 %v5055_v40  ;;  %v3428_v40 = vsub.s32 1, %v5590_v12 }
 0xd48   : > { %4459 = vmatpush1.bf16.msra.mxu0 %v5057_v41  ;;  %v3433_v41 = vrot.slane %v3420_v13, %v3432_v35 }
 0xd49   : > { %4461 = vmatprep.subr.bf16.mxu0 %v5074_v0 }
 0xdaa   : > { %v3079_v25 = vpop.xlane.xlu0 %3078 }
 0xdab   : > { %v3080_v26 = vsub.f32 %v3074_v60, %v3079_v25  ;;  %v5070_v60 = vld [vmem:[#allocation7 + $0x158] ss:$12 sps:$4 sm:$0xff]  }
 0xdad   : > { %v3081_v31 = vmul.f32 1.442695, %v3080_v26 }
 0xdaf   : > { %5126 = vpow2.f32 %v3081_v31 }
 0xdb9   : > { %v5127_v32 = vpop.eup %5126 }
 0xdba   : > { %v3083_v33 = vsel %vm2262_vm3, %v5127_v32, 0.0 }
 0xdbb   : > { %3084 = vadd.xlane.f32.xlu1 %v3083_v33 }
 0xdcc   : > { %3089 = vrot.lane.b32.xlu1 %v5585_v28, %s5298_s21 }
 0xdd0   : > { %4718 = vrot.lane.b32.xlu1 %v4717_v39, %s5298_s21 }
 0xe48   : > { %v3085_v38 = vpop.xlane.xlu1 %3084 }
 0xe49   : > { %5128 = vrcp.f32 %v3085_v38  ;;  %v3425_v38 = vrot.slane %v3420_v13, %v3424_v36 }
 0xe4c   : > { %v3090_v44 = vpop.permute.xlu1 %3089 }
 0xe4d   : > { %4357 = vmatpush3.msra.mxu1 %v3090_v44 }
 0xe4e   : > { %4493 = vmatprep.subr.bf16.mxu1 %v5058_v42  ;;  %v3429_v42 = vrot.slane %v3420_v13, %v3428_v40 }
 0xe50   : > { %v4719_v28 = vpop.permute.xlu1 %4718 }
 0xe51   : > { %v4721_v45 = vunpack.i.h.bf16 %v4719_v28  ;;  %v4720_v46 = vunpack.i.l.bf16 %v4719_v28 }
 0xe53   : > { %v5129_v47 = vpop.eup %5128  ;;  %v3178_v48 = vsel %vm2185_vm1, %v5646_v54, %v4720_v46  ;;  %v3177_v3 = vsel %vm2185_vm1, %v5611_v49, %v4721_v45  ;;  %v5064_v54 = vld [vmem:[#allocation7 + $0x110] ss:$12 sps:$4 sm:$0xff]  }
 0xe54   : > { %v3087_v39 = vmul.f32 %v5129_v47, %v5127_v32  ;;  %3501 = vmatprep.mubr.f32.mxu0 %v3178_v48  ;;  %v5065_v49 = vld [vmem:[#allocation7 + $0x50] ss:$12 sps:$4 sm:$0xff]  }
 0xe55   : > { %3502 = vmatmul.mubr.f32.vlgmr.msra.gmra.mrb[16].mxu0 %v3177_v3 }
 0xe56   : > { %4359 = vmatmul.mubr.msk.f32.vlgmr.msra.gmra.mrb[42].mxu1 %vm2262_vm3, %v3087_v39  ;;  %3572 = vmatprep.mubr.f32.mxu0 %v5295_v30 }
 0xe57   : > { %4495 = vmatpush3.bf16.msra.mxu1 %v5059_v37  ;;  %3643 = vmatprep.mubr.f32.mxu1 %v3178_v48 }
 0xe58   : > { %4497 = vmatprep.subr.bf16.mxu1 %v5060_v50  ;;  %4463 = vmatpush1.bf16.msra.mxu0 %v5076_v1 }
 0xe59   : > { %4465 = vmatprep.subr.bf16.mxu0 %v5078_v5 }
 0xe5b   : > { %4499 = vmatpush3.bf16.msra.mxu1 %v5061_v51 }
 0xe5c   : > { %4501 = vmatprep.subr.bf16.mxu1 %v5062_v52  ;;  %4467 = vmatpush1.bf16.msra.mxu0 %v5080_v6 }
 0xe5d   : > { %4469 = vmatprep.subr.bf16.mxu0 %v5082_v16 }
 0xe5f   : > { %4503 = vmatpush3.bf16.msra.mxu1 %v5063_v53 }
 0xe60   : > { %4505 = vmatprep.subr.bf16.mxu1 %v5064_v54  ;;  %4471 = vmatpush1.bf16.msra.mxu0 %v5084_v43 }
 0xe63   : > { %4507 = vmatpush3.bf16.msra.mxu1 %v5065_v49 }
 0xe64   : > { %4509 = vmatprep.subr.bf16.mxu1 %v5066_v56 }
 0xe67   : > { %4511 = vmatpush3.bf16.msra.mxu1 %v5067_v29 }
 0xe68   : > { %4513 = vmatprep.subr.bf16.mxu1 %v5068_v58 }
 0xe6b   : > { %4515 = vmatpush3.bf16.msra.mxu1 %v5069_v59 }
 0xe6c   : > { %4517 = vmatprep.subr.bf16.mxu1 %v5070_v60 }
 0xe6f   : > { %4519 = vmatpush3.bf16.msra.mxu1 %v5071_v61 }
 0xe70   : > { %4521 = vmatprep.subr.bf16.mxu1 %v5072_v62 }
 0xe73   : > { %4523 = vmatpush3.bf16.msra.mxu1 %v5073_v63 }
 0xe74   : > { %4524 = vmatprep.subr.bf16.mxu1 %v5300_v2 }
 0xe76   : > { %3644 = vmatmul.mubr.f32.vlgmr.msra.gmra.mrb[44].mxu1 %v3177_v3 }
 0xe77   : > { %4393 = vmatprep.mubr.msk.f32.mxu1 %vm5296_vm0, %v5295_v30  ;;  %4526 = vmatpush3.bf16.msra.mxu1 %v5077_v4  ;;  %v5086_v30 = vld [vmem:[#allocation7 + $0x1cc] ss:$12 sps:$4 sm:$0xff]  }
 0xe78   : > { %4527 = vmatprep.subr.bf16.mxu1 %v5300_v2  ;;  %4473 = vmatprep.subr.bf16.mxu0 %v5086_v30 }
 0xe79   : > { %4475 = vmatpush1.bf16.msra.mxu0 %v5088_v8 }
 0xe7a   : > { %4477 = vmatprep.subr.bf16.mxu0 %v5090_v9 }
 0xe7b   : > { %4529 = vmatpush3.bf16.msra.mxu1 %v5081_v7 }
 0xe7c   : > { %4530 = vmatprep.subr.bf16.mxu1 %v5300_v2 }
 0xe7d   : > { %4479 = vmatpush1.bf16.msra.mxu0 %v5092_v10 }
 0xe7e   : > { %4481 = vmatprep.subr.bf16.mxu0 %v5094_v14 }
 0xe7f   : > { %4532 = vmatpush3.bf16.msra.mxu1 %v5085_v27 }
 0xe80   : > { %4533 = vmatprep.subr.bf16.mxu1 %v5300_v2 }
 0xe81   : > { %4483 = vmatpush1.bf16.msra.mxu0 %v5096_v15 }
 0xe82   : > { %4485 = vmatprep.subr.bf16.mxu0 %v5098_v19 }
 0xe83   : > { %4535 = vmatpush3.bf16.msra.mxu1 %v5089_v17 }
 0xe84   : > { %4536 = vmatprep.subr.bf16.mxu1 %v5300_v2 }
 0xe85   : > { %4487 = vmatpush1.bf16.msra.mxu0 %v5100_v20 }
 0xe86   : > { %4489 = vmatprep.subr.bf16.mxu0 %v5102_v22 }
 0xe87   : > { %4538 = vmatpush3.bf16.msra.mxu1 %v5093_v11 }
 0xe88   : > { %4539 = vmatprep.subr.bf16.mxu1 %v5300_v2 }
 0xe89   : > { %4491 = vmatpush1.bf16.msra.mxu0 %v5104_v23 }
 0xe8b   : > { %4541 = vmatpush3.bf16.msra.mxu1 %v5097_v18 }
 0xe8c   : > { %4542 = vmatprep.subr.bf16.mxu1 %v5300_v2 }
 0xe8f   : > { %4544 = vmatpush3.bf16.msra.mxu1 %v5101_v21 }
 0xe90   : > { %4545 = vmatprep.subr.bf16.mxu1 %v5300_v2 }
 0xe93   : > { %4547 = vmatpush3.bf16.msra.mxu1 %v5105_v55 }
 0xf29   : > { %v3161_v24 = vpop.f32.mrb[42].mxu1 }
 0xf2a   : > { %3174 = vrot.lane.b32.xlu0 %v3161_v24, %s5298_s21  ;;  %v4360_v25 = vpop.f32.mrb[43].mxu1 }
 0xf49   : > { %v4221_v26 = vpop.f32.mrb[44].mxu1 }
 0xf4a   : > { %v4222_v31 = vpop.f32.mrb[45].mxu1 }
 0xf4b   : > { %v4223_v32 = vadd.f32 %v4222_v31, %v4221_v26 }
 0xf4d   : > { %v3646_v44 = vadd.f32 %v4223_v32, %v3433_v41 }
 0xf9c   : > { %v3175_v33 = vpop.permute.xlu0 %3174 }
 0xf9d   : > { %v3179_v34 = vsel %vm2185_vm1, %v5684_v57, %v3175_v33 }
 0xf9e   : > { %3573 = vmatmul.mubr.f32.vlgmr.msra.gmra.mrb[16].mxu0 %v3179_v34  ;;  %4394 = vmatmul.mubr.f32.vlgmr.msra.gmra.mrb[46].mxu1 %v3179_v34 }
0x1071   : > { %v3574_v57 = vpop.f32.mrb[16].mxu0  ;;  %v3715_v28 = vpop.f32.mrb[46].mxu1 }
0x1072   : > { %v4548_v45 = vadd.f32 %v3574_v57, %v3425_v38  ;;  %v3716_v46 = vadd.f32 %v3715_v28, %v3646_v44  ;;  %v3576_v47 = vpop.f32.mrb[17].mxu0  ;;  %v4395_v48 = vpop.f32.mrb[47].mxu1 }
0x1073   : > { %v4549_v3 = vadd.f32 %v3576_v47, %v3429_v42 }
0x1074   : > { %3719 = vst [vmem:[%s242_s25] sm:$0xff] %v4548_v45  ;;  %3721 = vst [vmem:[%s242_s25 + $0x10] sm:$0xff] %v3716_v46 }
0x1075   : > { %3720 = vst [vmem:[%s242_s25 + $0x8] sm:$0xff] %v4549_v3 }
0x1076   : > { %5229 = shalt.err (!%p5226_p2)
}
0x1077   : > { %s5230_s6 = scalar_lea.hbm %s5718_s28, 384  ;;  %s5234_s10 = scalar_lea.hbm %s5766_s4, 768 }
0x1078   : > { %p5231_p13 = scmp.ne.s32.totalorder %s5718_s28, %s5230_s6  ;;  %p5235_p4 = scmp.lt.u32.totalorder %s5718_s28, %s5766_s4 }
0x1079   : > { %p5236_p7 = scmp.lt.u32.totalorder %s5234_s10, %s5230_s6  ;;  %p5238_p11 = scmp.lt.u32.totalorder %s5230_s6, %s5718_s28 }
0x107a   : > { %p5232_p6 = pnand %p5231_p13, %p5780_p0 }
0x107b   : > { %p5237_p8 = por %p5236_p7, %p5235_p4 }
0x107c   : > { %p5233_p10 = pneg %p5232_p6 }
0x107d   : > { %p5239_p1 = por %p5238_p11, %p5237_p8 }
0x107f   : > { %p5240_p3 = pnand %p5239_p1, %p5233_p10 }
0x1081   : > { %5243 = shalt.err (!%p5240_p3)
}
0x1082   : > { %4650 = dma.vmem_to_hbm [thread:$0]  (%p5780_p0), %s5720_s7, 384, %s5718_s28, %s3723_s19  }
0x1083 PF: > { %s3749_s27 = sand.u32 1, %s5274_s15   ;;  %p5781_p5 = scmp.ne.s32.totalorder %s5771_s22, 0 }
0x1084   : > { %p5782_p9 = scmp.ge.s32.totalorder %s5286_s18, 2  ;;  %s3750_s5 = scalar_lea.sflag [#allocation4], %s3749_s27 }
0x1086   : > { %p4664_p12 = pnand %p5782_p9, %p5781_p5 }
0x1088   : > { %5269 = dma.done.wait (!%p4664_p12), %s3750_s5, 384  }
0x1089   : > { %5271 = vsyncadd (!%p4664_p12), %s3750_s5, 4294966912  ;;  %p18_p2 = scmp.ge.s32.totalorder %s5437_s11, 4   ;;  %s5783_s15 = smov %s5278_s16 }
0x108a   : > { %s5784_s16 = smov %s5282_s17  ;;  %s5785_s17 = smov %s5446_s14 }
0x108b   : > { %s5786_s18 = smov %s5437_s11  ;;  %20 = sbr.rel (!%p18_p2) target bundleno = 6 (0x6), region = 89 }
0x1092   :  { %3755 = vsyncpa [#allocation3], 1 }
0x1093   :  { %3757 = vsyncpa [#allocation3 + $0x1], 1 }
0x1094   :  { %3758 = vsyncpa [#allocation6], 1 }
0x1095   :  { %3759 = vsyncpa [#allocation4], 1 }
0x1096   :  { %3761 = vsyncpa [#allocation4 + $0x1], 1 }

</bundles_post_ra>
